<compile_context>
chip_gen: v7x
topology: tpu7x:2x2x1
jax: 0.10.0
libtpu: 0.0.40
codegen_flags: <defaults>
</compile_context>

<pallas_src>
import math

import jax
import jax.numpy as jnp
import numpy as np
from jax.experimental import pallas as pl
from jax.experimental.pallas import tpu as pltpu

VOCAB = 2 ** 15
HIDDEN = 96
NUM_CLASSES = 100

H_PAD = 128            # hidden, padded to one full lane tile
C_PAD = 128            # classes, padded to one full lane tile
G_PAD = 3 * H_PAD      # fused (r, z, n) gate width


# ----------------------------------------------------------------------------
# Kernel: per grid step = one time-chunk.
#   Phase 1: chunk-wide input projection (one lane-dense MXU matmul), with the
#            r/z half of b_hh pre-folded into the bias.
#   Phase 2: sequential GRU recurrence; per step two MXU dots split at the
#            256-lane pass boundary (r/z | n) so EUP work overlaps the MXU.
#   Phase 3: classifier matmul on the gathered "last" features (final chunk).
# ----------------------------------------------------------------------------
def gru_classifier_kernel(emb_ref,      # (TC*Bp, Hp)   bf16  time-major chunk
                          le_ref,       # (Bp, 1)       int32 last_elements
                          wih_ref,      # (Hp, 3*Hp)    bf16  fused W_ih^T
                          whh_rz_ref,   # (Hp, 2*Hp)    bf16  W_hh^T, r|z gates
                          whh_n_ref,    # (Hp, Hp)      bf16  W_hh^T, n gate
                          bi_ref,       # (1, 3*Hp)     f32   b_ih (+b_hh r,z)
                          bhn_ref,      # (1, Hp)       f32   b_hh, n gate only
                          wc_ref,       # (Hp, Cp)      f32   classifier W^T
                          bc_ref,       # (1, Cp)       f32
                          logits_ref,   # (Bp, Cp)      f32   output (resident)
                          h_scr,        # (Bp, Hp)      f32   hidden state
                          lf_scr,       # (Bp, Hp)      f32   gathered feature
                          gi_scr):      # (TC*Bp, 3*Hp) f32   input projection
    c = pl.program_id(0)
    bp, hp = h_scr.shape
    tc = gi_scr.shape[0] // bp

    @pl.when(c == 0)
    def _():
        h_scr[...] = jnp.zeros_like(h_scr)
        lf_scr[...] = jnp.zeros_like(lf_scr)

    # ---- Phase 1: hoisted input projection for the whole chunk -------------
    # M = tc*bp rows -> actually fills the MXU instead of using 8 rows/step.
    # bi_ref already contains b_ih for all gates + b_hh for the r/z gates.
    gi_scr[...] = (
        jnp.dot(emb_ref[...], wih_ref[...], preferred_element_type=jnp.float32)
        + bi_ref[...]
    )

    # ---- Phase 2: sequential recurrence -------------------------------------
    # Hoist loop-invariant broadcasts out of the (unrolled) loop body.
    le_b = jnp.broadcast_to(le_ref[...], (bp, hp))   # (Bp, Hp) int32
    bhn = bhn_ref[...]                               # (1, Hp) f32
    base_t = c * tc

    def step(t, carry):
        h, lf = carry                      # (Bp, Hp) f32 each
        row0 = pl.multiple_of(t * bp, bp)
        gi = gi_scr[pl.ds(row0, bp), :]    # (Bp, 3*Hp) f32, biases included
        h_bf = h.astype(jnp.bfloat16)
        # Two MXU passes: the r/z sigmoid chain can start as soon as the first
        # (256-lane) pass pops, overlapping the n-gate (128-lane) pass.
        gh_rz = jnp.dot(h_bf, whh_rz_ref[...],
                        preferred_element_type=jnp.float32)       # (Bp, 2*Hp)
        gh_n = (jnp.dot(h_bf, whh_n_ref[...],
                        preferred_element_type=jnp.float32)
                + bhn)                                            # (Bp, Hp)
        rz = jax.nn.sigmoid(gi[:, 0:2 * hp] + gh_rz)
        r = rz[:, 0:hp]
        z = rz[:, hp:2 * hp]
        n = jnp.tanh(gi[:, 2 * hp:3 * hp] + r * gh_n)
        h_new = (1.0 - z) * n + z * h
        # features[b, last_elements[b]] gather, done online with a mask.
        lf_new = jnp.where(le_b == base_t + t, h_new, lf)
        return h_new, lf_new

    unroll = tc if tc <= 16 else 8
    h_fin, lf_fin = jax.lax.fori_loop(
        0, tc, step, (h_scr[...], lf_scr[...]), unroll=unroll)
    h_scr[...] = h_fin
    lf_scr[...] = lf_fin

    # ---- Phase 3: classifier (only once, on the last chunk) ----------------
    @pl.when(c == pl.num_programs(0) - 1)
    def _():
        logits_ref[...] = (
            jnp.dot(lf_scr[...], wc_ref[...], preferred_element_type=jnp.float32)
            + bc_ref[...]
        )


# ----------------------------------------------------------------------------
# Parameter re-layout: PyTorch-style params -> fused / padded kernel params.
#   w_ih, w_hh: (3H, H), gate order (r, z, n);  b_ih, b_hh: (3H,)
#   w_c: (C, H);  b_c: (C,)
# Padded lanes are zero, which keeps padded hidden lanes exactly 0 through the
# GRU gate blend (gi=gh=0 -> n=0, h' = 0.5*0 + 0.5*0 = 0).
# ----------------------------------------------------------------------------
def prepare_kernel_params(params):
    H, Hp, C, Cp = HIDDEN, H_PAD, NUM_CLASSES, C_PAD
    w_ih, w_hh = params["w_ih"], params["w_hh"]
    b_ih, b_hh = params["b_ih"], params["b_hh"]

    def gate_w(w, g):                       # transposed (in, out) block
        return w[g * H:(g + 1) * H, :].T

    # Fused input weights over all three gates: (Hp, 3*Hp) bf16.
    wih_f = jnp.zeros((Hp, 3 * Hp), jnp.float32)
    for g in range(3):
        wih_f = wih_f.at[:H, g * Hp:g * Hp + H].set(gate_w(w_ih, g))
    wih_f = wih_f.astype(jnp.bfloat16)

    # Recurrent weights split at the 256-lane MXU pass boundary (r,z | n).
    whh_rz = jnp.zeros((Hp, 2 * Hp), jnp.float32)
    for g in range(2):
        whh_rz = whh_rz.at[:H, g * Hp:g * Hp + H].set(gate_w(w_hh, g))
    whh_rz = whh_rz.astype(jnp.bfloat16)
    whh_n = (jnp.zeros((Hp, Hp), jnp.float32)
             .at[:H, :H].set(gate_w(w_hh, 2))).astype(jnp.bfloat16)

    # Phase-1 bias: b_ih for all gates, PLUS b_hh folded in for r and z
    # (those gates only ever see gi + gh, so their hh bias can leave the
    # serial loop). The n gate keeps b_hh_n separate (multiplied by r).
    bi_f = jnp.zeros((1, 3 * Hp), jnp.float32)
    for g in range(3):
        bg = b_ih[g * H:(g + 1) * H]
        if g < 2:
            bg = bg + b_hh[g * H:(g + 1) * H]
        bi_f = bi_f.at[0, g * Hp:g * Hp + H].set(bg)
    bhn = jnp.zeros((1, Hp), jnp.float32).at[0, :H].set(b_hh[2 * H:3 * H])

    wc_p = jnp.zeros((Hp, Cp), jnp.float32).at[:H, :C].set(params["w_c"].T)
    bc_p = jnp.zeros((1, Cp), jnp.float32).at[0, :C].set(params["b_c"])
    return wih_f, whh_rz, whh_n, bi_f, bhn, wc_p, bc_p


def network_forward(ids, last_elements, params, *, time_chunk=256):
    """ids: [B, T] int32, last_elements: [B] int32 -> logits [B, NUM_CLASSES]."""
    B, T = ids.shape
    H, C, Hp, Cp = HIDDEN, NUM_CLASSES, H_PAD, C_PAD
    Bp = max(8, ((B + 7) // 8) * 8)
    TC = min(time_chunk, T)
    num_chunks = int(math.ceil(T / TC))
    T_pad = num_chunks * TC

    (wih_f, whh_rz, whh_n, bi_f, bhn, wc_p, bc_p) = prepare_kernel_params(params)

    # Gather embeddings directly in time-major order, in bf16 (no (B,T,H)
    # transpose round trip, half the HBM traffic of an f32 gather).
    emb_table = params["embedding"].astype(jnp.bfloat16)
    emb_t = jnp.take(emb_table, ids.T, axis=0)                   # (T, B, H) bf16
    emb_t = jnp.pad(emb_t, ((0, T_pad - T), (0, Bp - B), (0, Hp - H)))
    emb_2d = emb_t.reshape(T_pad * Bp, Hp)                       # (T_pad*Bp, Hp)

    # Guard out-of-range gather indices (padded rows get -1 -> never captured).
    le = jnp.clip(last_elements.astype(jnp.int32), 0, T - 1)
    le2d = jnp.full((Bp, 1), -1, jnp.int32).at[:B, 0].set(le)

    grid_spec = pltpu.PrefetchScalarGridSpec(
        num_scalar_prefetch=0,
        grid=(num_chunks,),
        in_specs=[
            pl.BlockSpec((TC * Bp, Hp), lambda c: (c, 0)),   # time-chunk of emb
            pl.BlockSpec((Bp, 1), lambda c: (0, 0)),         # last_elements
            pl.BlockSpec((Hp, G_PAD), lambda c: (0, 0)),     # fused W_ih^T
            pl.BlockSpec((Hp, 2 * Hp), lambda c: (0, 0)),    # W_hh^T (r,z)
            pl.BlockSpec((Hp, Hp), lambda c: (0, 0)),        # W_hh^T (n)
            pl.BlockSpec((1, G_PAD), lambda c: (0, 0)),      # fused bias
            pl.BlockSpec((1, Hp), lambda c: (0, 0)),         # b_hh (n)
            pl.BlockSpec((Hp, Cp), lambda c: (0, 0)),        # classifier W^T
            pl.BlockSpec((1, Cp), lambda c: (0, 0)),         # classifier b
        ],
        out_specs=pl.BlockSpec((Bp, Cp), lambda c: (0, 0)),  # resident output
        scratch_shapes=[
            pltpu.VMEM((Bp, Hp), jnp.float32),               # hidden state
            pltpu.VMEM((Bp, Hp), jnp.float32),               # gathered feature
            pltpu.VMEM((TC * Bp, G_PAD), jnp.float32),       # input projection
        ],
    )

    logits_p = pl.pallas_call(
        gru_classifier_kernel,
        out_shape=jax.ShapeDtypeStruct((Bp, Cp), jnp.float32),
        grid_spec=grid_spec,
        compiler_params=pltpu.CompilerParams(
            dimension_semantics=("arbitrary",),   # time axis is sequential
            # Explicit scoped-VMEM budget: plenty for this kernel (<2 MiB at
            # Bp=8/TC<=256) and safely under v7x's 64 MiB physical VMEM.
            vmem_limit_bytes=32 * 1024 * 1024,
        ),
    )(emb_2d, le2d, wih_f, whh_rz, whh_n, bi_f, bhn, wc_p, bc_p)

    return logits_p[:B, :C]


# ----------------------------------------------------------------------------
# Pure-JAX f32 reference (PyTorch nn.GRU semantics, gate order r, z, n).
# ----------------------------------------------------------------------------
def reference_forward(ids, last_elements, params):
    emb = jnp.take(params["embedding"], ids, axis=0)             # (B, T, H)
    B, T, H = emb.shape
    w_ih, w_hh = params["w_ih"], params["w_hh"]                  # (3H, H)
    b_ih, b_hh = params["b_ih"], params["b_hh"]                  # (3H,)

    def step(h, x_t):
        gi = x_t @ w_ih.T + b_ih
        gh = h @ w_hh.T + b_hh
        r = jax.nn.sigmoid(gi[:, :H] + gh[:, :H])
        z = jax.nn.sigmoid(gi[:, H:2 * H] + gh[:, H:2 * H])
        n = jnp.tanh(gi[:, 2 * H:] + r * gh[:, 2 * H:])
        h_new = (1.0 - z) * n + z * h
        return h_new, h_new

    h0 = jnp.zeros((B, H), jnp.float32)
    _, hs = jax.lax.scan(step, h0, jnp.transpose(emb, (1, 0, 2)))
    feats = jnp.transpose(hs, (1, 0, 2))                          # (B, T, H)
    last_feat = feats[jnp.arange(B), last_elements]
    return last_feat @ params["w_c"].T + params["b_c"]


def make_params(key):
    k = 1.0 / np.sqrt(HIDDEN)
    keys = jax.random.split(key, 7)
    return {
        "embedding": jax.random.normal(keys[0], (VOCAB, HIDDEN), jnp.float32),
        "w_ih": jax.random.uniform(keys[1], (3 * HIDDEN, HIDDEN), jnp.float32, -k, k),
        "w_hh": jax.random.uniform(keys[2], (3 * HIDDEN, HIDDEN), jnp.float32, -k, k),
        "b_ih": jax.random.uniform(keys[3], (3 * HIDDEN,), jnp.float32, -k, k),
        "b_hh": jax.random.uniform(keys[4], (3 * HIDDEN,), jnp.float32, -k, k),
        "w_c": jax.random.uniform(keys[5], (NUM_CLASSES, HIDDEN), jnp.float32, -k, k),
        "b_c": jax.random.uniform(keys[6], (NUM_CLASSES,), jnp.float32, -k, k),
    }


if __name__ == "__main__":
    B, T = 2, 8
    root = jax.random.PRNGKey(0)
    kp, kids, kle = jax.random.split(root, 3)

    params = make_params(kp)
    ids = jax.random.randint(kids, (B, T), 0, VOCAB, dtype=jnp.int32)
    last_elements = jax.random.randint(kle, (B,), 0, T, dtype=jnp.int32)

    logits = jax.block_until_ready(network_forward(ids, last_elements, params))
    ref = jax.block_until_ready(reference_forward(ids, last_elements, params))

    assert logits.shape == (B, NUM_CLASSES), logits.shape
    # bf16 weights/activations in the recurrence -> slightly looser tolerance.
    np.testing.assert_allclose(np.asarray(logits), np.asarray(ref),
                               rtol=2e-2, atol=2e-2)
    print("KERNEL_OK")
</pallas_src>

<mosaic_0001>
module attributes {stable_mosaic.version = 11 : i64} {
  func.func @gru_classifier_kernel(%arg0: i32, %arg1: memref<64x128xbf16, #tpu.memory_space<vmem>>, %arg2: memref<8x1xi32, #tpu.memory_space<vmem>>, %arg3: memref<128x384xbf16, #tpu.memory_space<vmem>>, %arg4: memref<128x256xbf16, #tpu.memory_space<vmem>>, %arg5: memref<128x128xbf16, #tpu.memory_space<vmem>>, %arg6: memref<1x384xf32, #tpu.memory_space<vmem>>, %arg7: memref<1x128xf32, #tpu.memory_space<vmem>>, %arg8: memref<128x128xf32, #tpu.memory_space<vmem>>, %arg9: memref<1x128xf32, #tpu.memory_space<vmem>>, %arg10: memref<8x128xf32, #tpu.memory_space<vmem>>, %arg11: memref<8x128xf32, #tpu.memory_space<vmem>>, %arg12: memref<8x128xf32, #tpu.memory_space<vmem>>, %arg13: memref<64x384xf32, #tpu.memory_space<vmem>>) attributes {dimension_semantics = [#tpu.dimension_semantics<arbitrary>], iteration_bounds = array<i64: 1>, scalar_prefetch = 0 : i64, scratch_operands = 3 : i64, tpu.core_type = #tpu.core_type<tc>, window_params = [{transform_indices = @transform_0, window_bounds = array<i64: 64, 128>}, {pipeline_mode = #tpu.pipeline_mode<synchronous>, transform_indices = @transform_1, window_bounds = array<i64: 8, 1>}, {pipeline_mode = #tpu.pipeline_mode<synchronous>, transform_indices = @transform_2, window_bounds = array<i64: 128, 384>}, {pipeline_mode = #tpu.pipeline_mode<synchronous>, transform_indices = @transform_3, window_bounds = array<i64: 128, 256>}, {pipeline_mode = #tpu.pipeline_mode<synchronous>, transform_indices = @transform_4, window_bounds = array<i64: 128, 128>}, {pipeline_mode = #tpu.pipeline_mode<synchronous>, transform_indices = @transform_5, window_bounds = array<i64: 1, 384>}, {pipeline_mode = #tpu.pipeline_mode<synchronous>, transform_indices = @transform_6, window_bounds = array<i64: 1, 128>}, {pipeline_mode = #tpu.pipeline_mode<synchronous>, transform_indices = @transform_7, window_bounds = array<i64: 128, 128>}, {pipeline_mode = #tpu.pipeline_mode<synchronous>, transform_indices = @transform_8, window_bounds = array<i64: 1, 128>}, {pipeline_mode = #tpu.pipeline_mode<synchronous>, transform_indices = @transform_9, window_bounds = array<i64: 8, 128>}]} {
    %c0_i32 = arith.constant 0 : i32
    %0 = arith.cmpi eq, %arg0, %c0_i32 : i32
    %1 = arith.extui %0 : i1 to i32
    %c0_i32_0 = arith.constant 0 : i32
    %2 = arith.cmpi ne, %1, %c0_i32_0 : i32
    scf.if %2 {
      %cst_104 = arith.constant 0.000000e+00 : f32
      %286 = vector.broadcast %cst_104 : f32 to vector<8x128xf32>
      %c0_105 = arith.constant 0 : index
      %c0_106 = arith.constant 0 : index
      %287 = vector.load %arg11[%c0_105, %c0_106] : memref<8x128xf32, #tpu.memory_space<vmem>>, vector<8x128xf32>
      tpu.vector_store %arg11[%c0_105, %c0_106], %286 {strides = array<i32>} : memref<8x128xf32, #tpu.memory_space<vmem>>, vector<8x128xf32>,
      %cst_107 = arith.constant 0.000000e+00 : f32
      %288 = vector.broadcast %cst_107 : f32 to vector<8x128xf32>
      %c0_108 = arith.constant 0 : index
      %c0_109 = arith.constant 0 : index
      %289 = vector.load %arg12[%c0_108, %c0_109] : memref<8x128xf32, #tpu.memory_space<vmem>>, vector<8x128xf32>
      tpu.vector_store %arg12[%c0_108, %c0_109], %288 {strides = array<i32>} : memref<8x128xf32, #tpu.memory_space<vmem>>, vector<8x128xf32>,
    } else {
    }
    %c0 = arith.constant 0 : index
    %c0_1 = arith.constant 0 : index
    %3 = vector.load %arg1[%c0, %c0_1] : memref<64x128xbf16, #tpu.memory_space<vmem>>, vector<64x128xbf16>
    %c0_2 = arith.constant 0 : index
    %c0_3 = arith.constant 0 : index
    %4 = vector.load %arg3[%c0_2, %c0_3] : memref<128x384xbf16, #tpu.memory_space<vmem>>, vector<128x384xbf16>
    %cst = arith.constant dense<0.000000e+00> : vector<64x384xf32>
    %5 = tpu.matmul %3, %4, %cst {dimension_numbers = #tpu.dot_dimension_numbers<[1], [0], [0], [1], [0, 0, 1, 1], [], []>} : vector<64x128xbf16>, vector<128x384xbf16>, vector<64x384xf32> -> vector<64x384xf32>
    %c0_4 = arith.constant 0 : index
    %c0_5 = arith.constant 0 : index
    %6 = vector.load %arg6[%c0_4, %c0_5] : memref<1x384xf32, #tpu.memory_space<vmem>>, vector<1x384xf32>
    %7 = vector.broadcast %6 : vector<1x384xf32> to vector<64x384xf32>
    %8 = arith.addf %5, %7 : vector<64x384xf32>
    %c0_6 = arith.constant 0 : index
    %c0_7 = arith.constant 0 : index
    %9 = vector.load %arg13[%c0_6, %c0_7] : memref<64x384xf32, #tpu.memory_space<vmem>>, vector<64x384xf32>
    tpu.vector_store %arg13[%c0_6, %c0_7], %8 {strides = array<i32>} : memref<64x384xf32, #tpu.memory_space<vmem>>, vector<64x384xf32>,
    %c0_8 = arith.constant 0 : index
    %c0_9 = arith.constant 0 : index
    %10 = vector.load %arg2[%c0_8, %c0_9] : memref<8x1xi32, #tpu.memory_space<vmem>>, vector<8x1xi32>
    %11 = vector.shape_cast %10 : vector<8x1xi32> to vector<8x1xi32>
    %12 = vector.broadcast %11 : vector<8x1xi32> to vector<8x128xi32>
    %c0_10 = arith.constant 0 : index
    %c0_11 = arith.constant 0 : index
    %13 = vector.load %arg7[%c0_10, %c0_11] : memref<1x128xf32, #tpu.memory_space<vmem>>, vector<1x128xf32>
    %c8_i32 = arith.constant 8 : i32
    %14 = arith.muli %arg0, %c8_i32 : i32
    %c0_12 = arith.constant 0 : index
    %c0_13 = arith.constant 0 : index
    %15 = vector.load %arg11[%c0_12, %c0_13] : memref<8x128xf32, #tpu.memory_space<vmem>>, vector<8x128xf32>
    %c0_14 = arith.constant 0 : index
    %c0_15 = arith.constant 0 : index
    %16 = vector.load %arg12[%c0_14, %c0_15] : memref<8x128xf32, #tpu.memory_space<vmem>>, vector<8x128xf32>
    %c0_i32_16 = arith.constant 0 : i32
    %c8_i32_17 = arith.constant 8 : i32
    %17 = arith.muli %c0_i32_16, %c8_i32_17 : i32
    %18 = tpu.assume_multiple %17, 8 : i32
    %19 = arith.index_cast %18 : i32 to index
    %c0_18 = arith.constant 0 : index
    %20 = vector.load %arg13[%19, %c0_18] : memref<64x384xf32, #tpu.memory_space<vmem>>, vector<8x384xf32>
    %21 = arith.truncf %15 : vector<8x128xf32> to vector<8x128xbf16>
    %c0_19 = arith.constant 0 : index
    %c0_20 = arith.constant 0 : index
    %22 = vector.load %arg4[%c0_19, %c0_20] : memref<128x256xbf16, #tpu.memory_space<vmem>>, vector<128x256xbf16>
    %cst_21 = arith.constant dense<0.000000e+00> : vector<8x256xf32>
    %23 = tpu.matmul %21, %22, %cst_21 {dimension_numbers = #tpu.dot_dimension_numbers<[1], [0], [0], [1], [0, 0, 1, 1], [], []>} : vector<8x128xbf16>, vector<128x256xbf16>, vector<8x256xf32> -> vector<8x256xf32>
    %c0_22 = arith.constant 0 : index
    %c0_23 = arith.constant 0 : index
    %24 = vector.load %arg5[%c0_22, %c0_23] : memref<128x128xbf16, #tpu.memory_space<vmem>>, vector<128x128xbf16>
    %cst_24 = arith.constant dense<0.000000e+00> : vector<8x128xf32>
    %25 = tpu.matmul %21, %24, %cst_24 {dimension_numbers = #tpu.dot_dimension_numbers<[1], [0], [0], [1], [0, 0, 1, 1], [], []>} : vector<8x128xbf16>, vector<128x128xbf16>, vector<8x128xf32> -> vector<8x128xf32>
    %26 = vector.broadcast %13 : vector<1x128xf32> to vector<8x128xf32>
    %27 = arith.addf %25, %26 : vector<8x128xf32>
    %28 = vector.extract_strided_slice %20 {offsets = [0, 0], sizes = [8, 256], strides = [1, 1]} : vector<8x384xf32> to vector<8x256xf32>
    %29 = arith.addf %28, %23 : vector<8x256xf32>
    %30 = arith.negf %29 : vector<8x256xf32>
    %31 = math.exp %30 : vector<8x256xf32>
    %cst_25 = arith.constant 1.000000e+00 : f32
    %32 = vector.broadcast %cst_25 : f32 to vector<8x256xf32>
    %33 = arith.addf %32, %31 : vector<8x256xf32>
    %34 = arith.divf %32, %33 : vector<8x256xf32>
    %35 = vector.extract_strided_slice %34 {offsets = [0, 0], sizes = [8, 128], strides = [1, 1]} : vector<8x256xf32> to vector<8x128xf32>
    %36 = vector.extract_strided_slice %34 {offsets = [0, 128], sizes = [8, 128], strides = [1, 1]} : vector<8x256xf32> to vector<8x128xf32>
    %37 = vector.extract_strided_slice %20 {offsets = [0, 256], sizes = [8, 128], strides = [1, 1]} : vector<8x384xf32> to vector<8x128xf32>
    %38 = arith.mulf %35, %27 : vector<8x128xf32>
    %39 = arith.addf %37, %38 : vector<8x128xf32>
    %40 = math.tanh %39 : vector<8x128xf32>
    %cst_26 = arith.constant 1.000000e+00 : f32
    %41 = vector.broadcast %cst_26 : f32 to vector<8x128xf32>
    %42 = arith.subf %41, %36 : vector<8x128xf32>
    %43 = arith.mulf %42, %40 : vector<8x128xf32>
    %44 = arith.mulf %36, %15 : vector<8x128xf32>
    %45 = arith.addf %43, %44 : vector<8x128xf32>
    %46 = arith.addi %14, %c0_i32_16 : i32
    %47 = vector.broadcast %46 : i32 to vector<8x128xi32>
    %48 = arith.cmpi eq, %12, %47 : vector<8x128xi32>
    %49 = arith.select %48, %45, %16 : vector<8x128xi1>, vector<8x128xf32>
    %c1_i32 = arith.constant 1 : i32
    %c8_i32_27 = arith.constant 8 : i32
    %50 = arith.muli %c1_i32, %c8_i32_27 : i32
    %51 = tpu.assume_multiple %50, 8 : i32
    %52 = arith.index_cast %51 : i32 to index
    %c0_28 = arith.constant 0 : index
    %53 = vector.load %arg13[%52, %c0_28] : memref<64x384xf32, #tpu.memory_space<vmem>>, vector<8x384xf32>
    %54 = arith.truncf %45 : vector<8x128xf32> to vector<8x128xbf16>
    %c0_29 = arith.constant 0 : index
    %c0_30 = arith.constant 0 : index
    %55 = vector.load %arg4[%c0_29, %c0_30] : memref<128x256xbf16, #tpu.memory_space<vmem>>, vector<128x256xbf16>
    %cst_31 = arith.constant dense<0.000000e+00> : vector<8x256xf32>
    %56 = tpu.matmul %54, %55, %cst_31 {dimension_numbers = #tpu.dot_dimension_numbers<[1], [0], [0], [1], [0, 0, 1, 1], [], []>} : vector<8x128xbf16>, vector<128x256xbf16>, vector<8x256xf32> -> vector<8x256xf32>
    %c0_32 = arith.constant 0 : index
    %c0_33 = arith.constant 0 : index
    %57 = vector.load %arg5[%c0_32, %c0_33] : memref<128x128xbf16, #tpu.memory_space<vmem>>, vector<128x128xbf16>
    %cst_34 = arith.constant dense<0.000000e+00> : vector<8x128xf32>
    %58 = tpu.matmul %54, %57, %cst_34 {dimension_numbers = #tpu.dot_dimension_numbers<[1], [0], [0], [1], [0, 0, 1, 1], [], []>} : vector<8x128xbf16>, vector<128x128xbf16>, vector<8x128xf32> -> vector<8x128xf32>
    %59 = vector.broadcast %13 : vector<1x128xf32> to vector<8x128xf32>
    %60 = arith.addf %58, %59 : vector<8x128xf32>
    %61 = vector.extract_strided_slice %53 {offsets = [0, 0], sizes = [8, 256], strides = [1, 1]} : vector<8x384xf32> to vector<8x256xf32>
    %62 = arith.addf %61, %56 : vector<8x256xf32>
    %63 = arith.negf %62 : vector<8x256xf32>
    %64 = math.exp %63 : vector<8x256xf32>
    %cst_35 = arith.constant 1.000000e+00 : f32
    %65 = vector.broadcast %cst_35 : f32 to vector<8x256xf32>
    %66 = arith.addf %65, %64 : vector<8x256xf32>
    %67 = arith.divf %65, %66 : vector<8x256xf32>
    %68 = vector.extract_strided_slice %67 {offsets = [0, 0], sizes = [8, 128], strides = [1, 1]} : vector<8x256xf32> to vector<8x128xf32>
    %69 = vector.extract_strided_slice %67 {offsets = [0, 128], sizes = [8, 128], strides = [1, 1]} : vector<8x256xf32> to vector<8x128xf32>
    %70 = vector.extract_strided_slice %53 {offsets = [0, 256], sizes = [8, 128], strides = [1, 1]} : vector<8x384xf32> to vector<8x128xf32>
    %71 = arith.mulf %68, %60 : vector<8x128xf32>
    %72 = arith.addf %70, %71 : vector<8x128xf32>
    %73 = math.tanh %72 : vector<8x128xf32>
    %cst_36 = arith.constant 1.000000e+00 : f32
    %74 = vector.broadcast %cst_36 : f32 to vector<8x128xf32>
    %75 = arith.subf %74, %69 : vector<8x128xf32>
    %76 = arith.mulf %75, %73 : vector<8x128xf32>
    %77 = arith.mulf %69, %45 : vector<8x128xf32>
    %78 = arith.addf %76, %77 : vector<8x128xf32>
    %79 = arith.addi %14, %c1_i32 : i32
    %80 = vector.broadcast %79 : i32 to vector<8x128xi32>
    %81 = arith.cmpi eq, %12, %80 : vector<8x128xi32>
    %82 = arith.select %81, %78, %49 : vector<8x128xi1>, vector<8x128xf32>
    %c2_i32 = arith.constant 2 : i32
    %c8_i32_37 = arith.constant 8 : i32
    %83 = arith.muli %c2_i32, %c8_i32_37 : i32
    %84 = tpu.assume_multiple %83, 8 : i32
    %85 = arith.index_cast %84 : i32 to index
    %c0_38 = arith.constant 0 : index
    %86 = vector.load %arg13[%85, %c0_38] : memref<64x384xf32, #tpu.memory_space<vmem>>, vector<8x384xf32>
    %87 = arith.truncf %78 : vector<8x128xf32> to vector<8x128xbf16>
    %c0_39 = arith.constant 0 : index
    %c0_40 = arith.constant 0 : index
    %88 = vector.load %arg4[%c0_39, %c0_40] : memref<128x256xbf16, #tpu.memory_space<vmem>>, vector<128x256xbf16>
    %cst_41 = arith.constant dense<0.000000e+00> : vector<8x256xf32>
    %89 = tpu.matmul %87, %88, %cst_41 {dimension_numbers = #tpu.dot_dimension_numbers<[1], [0], [0], [1], [0, 0, 1, 1], [], []>} : vector<8x128xbf16>, vector<128x256xbf16>, vector<8x256xf32> -> vector<8x256xf32>
    %c0_42 = arith.constant 0 : index
    %c0_43 = arith.constant 0 : index
    %90 = vector.load %arg5[%c0_42, %c0_43] : memref<128x128xbf16, #tpu.memory_space<vmem>>, vector<128x128xbf16>
    %cst_44 = arith.constant dense<0.000000e+00> : vector<8x128xf32>
    %91 = tpu.matmul %87, %90, %cst_44 {dimension_numbers = #tpu.dot_dimension_numbers<[1], [0], [0], [1], [0, 0, 1, 1], [], []>} : vector<8x128xbf16>, vector<128x128xbf16>, vector<8x128xf32> -> vector<8x128xf32>
    %92 = vector.broadcast %13 : vector<1x128xf32> to vector<8x128xf32>
    %93 = arith.addf %91, %92 : vector<8x128xf32>
    %94 = vector.extract_strided_slice %86 {offsets = [0, 0], sizes = [8, 256], strides = [1, 1]} : vector<8x384xf32> to vector<8x256xf32>
    %95 = arith.addf %94, %89 : vector<8x256xf32>
    %96 = arith.negf %95 : vector<8x256xf32>
    %97 = math.exp %96 : vector<8x256xf32>
    %cst_45 = arith.constant 1.000000e+00 : f32
    %98 = vector.broadcast %cst_45 : f32 to vector<8x256xf32>
    %99 = arith.addf %98, %97 : vector<8x256xf32>
    %100 = arith.divf %98, %99 : vector<8x256xf32>
    %101 = vector.extract_strided_slice %100 {offsets = [0, 0], sizes = [8, 128], strides = [1, 1]} : vector<8x256xf32> to vector<8x128xf32>
    %102 = vector.extract_strided_slice %100 {offsets = [0, 128], sizes = [8, 128], strides = [1, 1]} : vector<8x256xf32> to vector<8x128xf32>
    %103 = vector.extract_strided_slice %86 {offsets = [0, 256], sizes = [8, 128], strides = [1, 1]} : vector<8x384xf32> to vector<8x128xf32>
    %104 = arith.mulf %101, %93 : vector<8x128xf32>
    %105 = arith.addf %103, %104 : vector<8x128xf32>
    %106 = math.tanh %105 : vector<8x128xf32>
    %cst_46 = arith.constant 1.000000e+00 : f32
    %107 = vector.broadcast %cst_46 : f32 to vector<8x128xf32>
    %108 = arith.subf %107, %102 : vector<8x128xf32>
    %109 = arith.mulf %108, %106 : vector<8x128xf32>
    %110 = arith.mulf %102, %78 : vector<8x128xf32>
    %111 = arith.addf %109, %110 : vector<8x128xf32>
    %112 = arith.addi %14, %c2_i32 : i32
    %113 = vector.broadcast %112 : i32 to vector<8x128xi32>
    %114 = arith.cmpi eq, %12, %113 : vector<8x128xi32>
    %115 = arith.select %114, %111, %82 : vector<8x128xi1>, vector<8x128xf32>
    %c3_i32 = arith.constant 3 : i32
    %c8_i32_47 = arith.constant 8 : i32
    %116 = arith.muli %c3_i32, %c8_i32_47 : i32
    %117 = tpu.assume_multiple %116, 8 : i32
    %118 = arith.index_cast %117 : i32 to index
    %c0_48 = arith.constant 0 : index
    %119 = vector.load %arg13[%118, %c0_48] : memref<64x384xf32, #tpu.memory_space<vmem>>, vector<8x384xf32>
    %120 = arith.truncf %111 : vector<8x128xf32> to vector<8x128xbf16>
    %c0_49 = arith.constant 0 : index
    %c0_50 = arith.constant 0 : index
    %121 = vector.load %arg4[%c0_49, %c0_50] : memref<128x256xbf16, #tpu.memory_space<vmem>>, vector<128x256xbf16>
    %cst_51 = arith.constant dense<0.000000e+00> : vector<8x256xf32>
    %122 = tpu.matmul %120, %121, %cst_51 {dimension_numbers = #tpu.dot_dimension_numbers<[1], [0], [0], [1], [0, 0, 1, 1], [], []>} : vector<8x128xbf16>, vector<128x256xbf16>, vector<8x256xf32> -> vector<8x256xf32>
    %c0_52 = arith.constant 0 : index
    %c0_53 = arith.constant 0 : index
    %123 = vector.load %arg5[%c0_52, %c0_53] : memref<128x128xbf16, #tpu.memory_space<vmem>>, vector<128x128xbf16>
    %cst_54 = arith.constant dense<0.000000e+00> : vector<8x128xf32>
    %124 = tpu.matmul %120, %123, %cst_54 {dimension_numbers = #tpu.dot_dimension_numbers<[1], [0], [0], [1], [0, 0, 1, 1], [], []>} : vector<8x128xbf16>, vector<128x128xbf16>, vector<8x128xf32> -> vector<8x128xf32>
    %125 = vector.broadcast %13 : vector<1x128xf32> to vector<8x128xf32>
    %126 = arith.addf %124, %125 : vector<8x128xf32>
    %127 = vector.extract_strided_slice %119 {offsets = [0, 0], sizes = [8, 256], strides = [1, 1]} : vector<8x384xf32> to vector<8x256xf32>
    %128 = arith.addf %127, %122 : vector<8x256xf32>
    %129 = arith.negf %128 : vector<8x256xf32>
    %130 = math.exp %129 : vector<8x256xf32>
    %cst_55 = arith.constant 1.000000e+00 : f32
    %131 = vector.broadcast %cst_55 : f32 to vector<8x256xf32>
    %132 = arith.addf %131, %130 : vector<8x256xf32>
    %133 = arith.divf %131, %132 : vector<8x256xf32>
    %134 = vector.extract_strided_slice %133 {offsets = [0, 0], sizes = [8, 128], strides = [1, 1]} : vector<8x256xf32> to vector<8x128xf32>
    %135 = vector.extract_strided_slice %133 {offsets = [0, 128], sizes = [8, 128], strides = [1, 1]} : vector<8x256xf32> to vector<8x128xf32>
    %136 = vector.extract_strided_slice %119 {offsets = [0, 256], sizes = [8, 128], strides = [1, 1]} : vector<8x384xf32> to vector<8x128xf32>
    %137 = arith.mulf %134, %126 : vector<8x128xf32>
    %138 = arith.addf %136, %137 : vector<8x128xf32>
    %139 = math.tanh %138 : vector<8x128xf32>
    %cst_56 = arith.constant 1.000000e+00 : f32
    %140 = vector.broadcast %cst_56 : f32 to vector<8x128xf32>
    %141 = arith.subf %140, %135 : vector<8x128xf32>
    %142 = arith.mulf %141, %139 : vector<8x128xf32>
    %143 = arith.mulf %135, %111 : vector<8x128xf32>
    %144 = arith.addf %142, %143 : vector<8x128xf32>
    %145 = arith.addi %14, %c3_i32 : i32
    %146 = vector.broadcast %145 : i32 to vector<8x128xi32>
    %147 = arith.cmpi eq, %12, %146 : vector<8x128xi32>
    %148 = arith.select %147, %144, %115 : vector<8x128xi1>, vector<8x128xf32>
    %c4_i32 = arith.constant 4 : i32
    %c8_i32_57 = arith.constant 8 : i32
    %149 = arith.muli %c4_i32, %c8_i32_57 : i32
    %150 = tpu.assume_multiple %149, 8 : i32
    %151 = arith.index_cast %150 : i32 to index
    %c0_58 = arith.constant 0 : index
    %152 = vector.load %arg13[%151, %c0_58] : memref<64x384xf32, #tpu.memory_space<vmem>>, vector<8x384xf32>
    %153 = arith.truncf %144 : vector<8x128xf32> to vector<8x128xbf16>
    %c0_59 = arith.constant 0 : index
    %c0_60 = arith.constant 0 : index
    %154 = vector.load %arg4[%c0_59, %c0_60] : memref<128x256xbf16, #tpu.memory_space<vmem>>, vector<128x256xbf16>
    %cst_61 = arith.constant dense<0.000000e+00> : vector<8x256xf32>
    %155 = tpu.matmul %153, %154, %cst_61 {dimension_numbers = #tpu.dot_dimension_numbers<[1], [0], [0], [1], [0, 0, 1, 1], [], []>} : vector<8x128xbf16>, vector<128x256xbf16>, vector<8x256xf32> -> vector<8x256xf32>
    %c0_62 = arith.constant 0 : index
    %c0_63 = arith.constant 0 : index
    %156 = vector.load %arg5[%c0_62, %c0_63] : memref<128x128xbf16, #tpu.memory_space<vmem>>, vector<128x128xbf16>
    %cst_64 = arith.constant dense<0.000000e+00> : vector<8x128xf32>
    %157 = tpu.matmul %153, %156, %cst_64 {dimension_numbers = #tpu.dot_dimension_numbers<[1], [0], [0], [1], [0, 0, 1, 1], [], []>} : vector<8x128xbf16>, vector<128x128xbf16>, vector<8x128xf32> -> vector<8x128xf32>
    %158 = vector.broadcast %13 : vector<1x128xf32> to vector<8x128xf32>
    %159 = arith.addf %157, %158 : vector<8x128xf32>
    %160 = vector.extract_strided_slice %152 {offsets = [0, 0], sizes = [8, 256], strides = [1, 1]} : vector<8x384xf32> to vector<8x256xf32>
    %161 = arith.addf %160, %155 : vector<8x256xf32>
    %162 = arith.negf %161 : vector<8x256xf32>
    %163 = math.exp %162 : vector<8x256xf32>
    %cst_65 = arith.constant 1.000000e+00 : f32
    %164 = vector.broadcast %cst_65 : f32 to vector<8x256xf32>
    %165 = arith.addf %164, %163 : vector<8x256xf32>
    %166 = arith.divf %164, %165 : vector<8x256xf32>
    %167 = vector.extract_strided_slice %166 {offsets = [0, 0], sizes = [8, 128], strides = [1, 1]} : vector<8x256xf32> to vector<8x128xf32>
    %168 = vector.extract_strided_slice %166 {offsets = [0, 128], sizes = [8, 128], strides = [1, 1]} : vector<8x256xf32> to vector<8x128xf32>
    %169 = vector.extract_strided_slice %152 {offsets = [0, 256], sizes = [8, 128], strides = [1, 1]} : vector<8x384xf32> to vector<8x128xf32>
    %170 = arith.mulf %167, %159 : vector<8x128xf32>
    %171 = arith.addf %169, %170 : vector<8x128xf32>
    %172 = math.tanh %171 : vector<8x128xf32>
    %cst_66 = arith.constant 1.000000e+00 : f32
    %173 = vector.broadcast %cst_66 : f32 to vector<8x128xf32>
    %174 = arith.subf %173, %168 : vector<8x128xf32>
    %175 = arith.mulf %174, %172 : vector<8x128xf32>
    %176 = arith.mulf %168, %144 : vector<8x128xf32>
    %177 = arith.addf %175, %176 : vector<8x128xf32>
    %178 = arith.addi %14, %c4_i32 : i32
    %179 = vector.broadcast %178 : i32 to vector<8x128xi32>
    %180 = arith.cmpi eq, %12, %179 : vector<8x128xi32>
    %181 = arith.select %180, %177, %148 : vector<8x128xi1>, vector<8x128xf32>
    %c5_i32 = arith.constant 5 : i32
    %c8_i32_67 = arith.constant 8 : i32
    %182 = arith.muli %c5_i32, %c8_i32_67 : i32
    %183 = tpu.assume_multiple %182, 8 : i32
    %184 = arith.index_cast %183 : i32 to index
    %c0_68 = arith.constant 0 : index
    %185 = vector.load %arg13[%184, %c0_68] : memref<64x384xf32, #tpu.memory_space<vmem>>, vector<8x384xf32>
    %186 = arith.truncf %177 : vector<8x128xf32> to vector<8x128xbf16>
    %c0_69 = arith.constant 0 : index
    %c0_70 = arith.constant 0 : index
    %187 = vector.load %arg4[%c0_69, %c0_70] : memref<128x256xbf16, #tpu.memory_space<vmem>>, vector<128x256xbf16>
    %cst_71 = arith.constant dense<0.000000e+00> : vector<8x256xf32>
    %188 = tpu.matmul %186, %187, %cst_71 {dimension_numbers = #tpu.dot_dimension_numbers<[1], [0], [0], [1], [0, 0, 1, 1], [], []>} : vector<8x128xbf16>, vector<128x256xbf16>, vector<8x256xf32> -> vector<8x256xf32>
    %c0_72 = arith.constant 0 : index
    %c0_73 = arith.constant 0 : index
    %189 = vector.load %arg5[%c0_72, %c0_73] : memref<128x128xbf16, #tpu.memory_space<vmem>>, vector<128x128xbf16>
    %cst_74 = arith.constant dense<0.000000e+00> : vector<8x128xf32>
    %190 = tpu.matmul %186, %189, %cst_74 {dimension_numbers = #tpu.dot_dimension_numbers<[1], [0], [0], [1], [0, 0, 1, 1], [], []>} : vector<8x128xbf16>, vector<128x128xbf16>, vector<8x128xf32> -> vector<8x128xf32>
    %191 = vector.broadcast %13 : vector<1x128xf32> to vector<8x128xf32>
    %192 = arith.addf %190, %191 : vector<8x128xf32>
    %193 = vector.extract_strided_slice %185 {offsets = [0, 0], sizes = [8, 256], strides = [1, 1]} : vector<8x384xf32> to vector<8x256xf32>
    %194 = arith.addf %193, %188 : vector<8x256xf32>
    %195 = arith.negf %194 : vector<8x256xf32>
    %196 = math.exp %195 : vector<8x256xf32>
    %cst_75 = arith.constant 1.000000e+00 : f32
    %197 = vector.broadcast %cst_75 : f32 to vector<8x256xf32>
    %198 = arith.addf %197, %196 : vector<8x256xf32>
    %199 = arith.divf %197, %198 : vector<8x256xf32>
    %200 = vector.extract_strided_slice %199 {offsets = [0, 0], sizes = [8, 128], strides = [1, 1]} : vector<8x256xf32> to vector<8x128xf32>
    %201 = vector.extract_strided_slice %199 {offsets = [0, 128], sizes = [8, 128], strides = [1, 1]} : vector<8x256xf32> to vector<8x128xf32>
    %202 = vector.extract_strided_slice %185 {offsets = [0, 256], sizes = [8, 128], strides = [1, 1]} : vector<8x384xf32> to vector<8x128xf32>
    %203 = arith.mulf %200, %192 : vector<8x128xf32>
    %204 = arith.addf %202, %203 : vector<8x128xf32>
    %205 = math.tanh %204 : vector<8x128xf32>
    %cst_76 = arith.constant 1.000000e+00 : f32
    %206 = vector.broadcast %cst_76 : f32 to vector<8x128xf32>
    %207 = arith.subf %206, %201 : vector<8x128xf32>
    %208 = arith.mulf %207, %205 : vector<8x128xf32>
    %209 = arith.mulf %201, %177 : vector<8x128xf32>
    %210 = arith.addf %208, %209 : vector<8x128xf32>
    %211 = arith.addi %14, %c5_i32 : i32
    %212 = vector.broadcast %211 : i32 to vector<8x128xi32>
    %213 = arith.cmpi eq, %12, %212 : vector<8x128xi32>
    %214 = arith.select %213, %210, %181 : vector<8x128xi1>, vector<8x128xf32>
    %c6_i32 = arith.constant 6 : i32
    %c8_i32_77 = arith.constant 8 : i32
    %215 = arith.muli %c6_i32, %c8_i32_77 : i32
    %216 = tpu.assume_multiple %215, 8 : i32
    %217 = arith.index_cast %216 : i32 to index
    %c0_78 = arith.constant 0 : index
    %218 = vector.load %arg13[%217, %c0_78] : memref<64x384xf32, #tpu.memory_space<vmem>>, vector<8x384xf32>
    %219 = arith.truncf %210 : vector<8x128xf32> to vector<8x128xbf16>
    %c0_79 = arith.constant 0 : index
    %c0_80 = arith.constant 0 : index
    %220 = vector.load %arg4[%c0_79, %c0_80] : memref<128x256xbf16, #tpu.memory_space<vmem>>, vector<128x256xbf16>
    %cst_81 = arith.constant dense<0.000000e+00> : vector<8x256xf32>
    %221 = tpu.matmul %219, %220, %cst_81 {dimension_numbers = #tpu.dot_dimension_numbers<[1], [0], [0], [1], [0, 0, 1, 1], [], []>} : vector<8x128xbf16>, vector<128x256xbf16>, vector<8x256xf32> -> vector<8x256xf32>
    %c0_82 = arith.constant 0 : index
    %c0_83 = arith.constant 0 : index
    %222 = vector.load %arg5[%c0_82, %c0_83] : memref<128x128xbf16, #tpu.memory_space<vmem>>, vector<128x128xbf16>
    %cst_84 = arith.constant dense<0.000000e+00> : vector<8x128xf32>
    %223 = tpu.matmul %219, %222, %cst_84 {dimension_numbers = #tpu.dot_dimension_numbers<[1], [0], [0], [1], [0, 0, 1, 1], [], []>} : vector<8x128xbf16>, vector<128x128xbf16>, vector<8x128xf32> -> vector<8x128xf32>
    %224 = vector.broadcast %13 : vector<1x128xf32> to vector<8x128xf32>
    %225 = arith.addf %223, %224 : vector<8x128xf32>
    %226 = vector.extract_strided_slice %218 {offsets = [0, 0], sizes = [8, 256], strides = [1, 1]} : vector<8x384xf32> to vector<8x256xf32>
    %227 = arith.addf %226, %221 : vector<8x256xf32>
    %228 = arith.negf %227 : vector<8x256xf32>
    %229 = math.exp %228 : vector<8x256xf32>
    %cst_85 = arith.constant 1.000000e+00 : f32
    %230 = vector.broadcast %cst_85 : f32 to vector<8x256xf32>
    %231 = arith.addf %230, %229 : vector<8x256xf32>
    %232 = arith.divf %230, %231 : vector<8x256xf32>
    %233 = vector.extract_strided_slice %232 {offsets = [0, 0], sizes = [8, 128], strides = [1, 1]} : vector<8x256xf32> to vector<8x128xf32>
    %234 = vector.extract_strided_slice %232 {offsets = [0, 128], sizes = [8, 128], strides = [1, 1]} : vector<8x256xf32> to vector<8x128xf32>
    %235 = vector.extract_strided_slice %218 {offsets = [0, 256], sizes = [8, 128], strides = [1, 1]} : vector<8x384xf32> to vector<8x128xf32>
    %236 = arith.mulf %233, %225 : vector<8x128xf32>
    %237 = arith.addf %235, %236 : vector<8x128xf32>
    %238 = math.tanh %237 : vector<8x128xf32>
    %cst_86 = arith.constant 1.000000e+00 : f32
    %239 = vector.broadcast %cst_86 : f32 to vector<8x128xf32>
    %240 = arith.subf %239, %234 : vector<8x128xf32>
    %241 = arith.mulf %240, %238 : vector<8x128xf32>
    %242 = arith.mulf %234, %210 : vector<8x128xf32>
    %243 = arith.addf %241, %242 : vector<8x128xf32>
    %244 = arith.addi %14, %c6_i32 : i32
    %245 = vector.broadcast %244 : i32 to vector<8x128xi32>
    %246 = arith.cmpi eq, %12, %245 : vector<8x128xi32>
    %247 = arith.select %246, %243, %214 : vector<8x128xi1>, vector<8x128xf32>
    %c7_i32 = arith.constant 7 : i32
    %c8_i32_87 = arith.constant 8 : i32
    %248 = arith.muli %c7_i32, %c8_i32_87 : i32
    %249 = tpu.assume_multiple %248, 8 : i32
    %250 = arith.index_cast %249 : i32 to index
    %c0_88 = arith.constant 0 : index
    %251 = vector.load %arg13[%250, %c0_88] : memref<64x384xf32, #tpu.memory_space<vmem>>, vector<8x384xf32>
    %252 = arith.truncf %243 : vector<8x128xf32> to vector<8x128xbf16>
    %c0_89 = arith.constant 0 : index
    %c0_90 = arith.constant 0 : index
    %253 = vector.load %arg4[%c0_89, %c0_90] : memref<128x256xbf16, #tpu.memory_space<vmem>>, vector<128x256xbf16>
    %cst_91 = arith.constant dense<0.000000e+00> : vector<8x256xf32>
    %254 = tpu.matmul %252, %253, %cst_91 {dimension_numbers = #tpu.dot_dimension_numbers<[1], [0], [0], [1], [0, 0, 1, 1], [], []>} : vector<8x128xbf16>, vector<128x256xbf16>, vector<8x256xf32> -> vector<8x256xf32>
    %c0_92 = arith.constant 0 : index
    %c0_93 = arith.constant 0 : index
    %255 = vector.load %arg5[%c0_92, %c0_93] : memref<128x128xbf16, #tpu.memory_space<vmem>>, vector<128x128xbf16>
    %cst_94 = arith.constant dense<0.000000e+00> : vector<8x128xf32>
    %256 = tpu.matmul %252, %255, %cst_94 {dimension_numbers = #tpu.dot_dimension_numbers<[1], [0], [0], [1], [0, 0, 1, 1], [], []>} : vector<8x128xbf16>, vector<128x128xbf16>, vector<8x128xf32> -> vector<8x128xf32>
    %257 = vector.broadcast %13 : vector<1x128xf32> to vector<8x128xf32>
    %258 = arith.addf %256, %257 : vector<8x128xf32>
    %259 = vector.extract_strided_slice %251 {offsets = [0, 0], sizes = [8, 256], strides = [1, 1]} : vector<8x384xf32> to vector<8x256xf32>
    %260 = arith.addf %259, %254 : vector<8x256xf32>
    %261 = arith.negf %260 : vector<8x256xf32>
    %262 = math.exp %261 : vector<8x256xf32>
    %cst_95 = arith.constant 1.000000e+00 : f32
    %263 = vector.broadcast %cst_95 : f32 to vector<8x256xf32>
    %264 = arith.addf %263, %262 : vector<8x256xf32>
    %265 = arith.divf %263, %264 : vector<8x256xf32>
    %266 = vector.extract_strided_slice %265 {offsets = [0, 0], sizes = [8, 128], strides = [1, 1]} : vector<8x256xf32> to vector<8x128xf32>
    %267 = vector.extract_strided_slice %265 {offsets = [0, 128], sizes = [8, 128], strides = [1, 1]} : vector<8x256xf32> to vector<8x128xf32>
    %268 = vector.extract_strided_slice %251 {offsets = [0, 256], sizes = [8, 128], strides = [1, 1]} : vector<8x384xf32> to vector<8x128xf32>
    %269 = arith.mulf %266, %258 : vector<8x128xf32>
    %270 = arith.addf %268, %269 : vector<8x128xf32>
    %271 = math.tanh %270 : vector<8x128xf32>
    %cst_96 = arith.constant 1.000000e+00 : f32
    %272 = vector.broadcast %cst_96 : f32 to vector<8x128xf32>
    %273 = arith.subf %272, %267 : vector<8x128xf32>
    %274 = arith.mulf %273, %271 : vector<8x128xf32>
    %275 = arith.mulf %267, %243 : vector<8x128xf32>
    %276 = arith.addf %274, %275 : vector<8x128xf32>
    %277 = arith.addi %14, %c7_i32 : i32
    %278 = vector.broadcast %277 : i32 to vector<8x128xi32>
    %279 = arith.cmpi eq, %12, %278 : vector<8x128xi32>
    %280 = arith.select %279, %276, %247 : vector<8x128xi1>, vector<8x128xf32>
    %c8_i32_97 = arith.constant 8 : i32
    %c0_98 = arith.constant 0 : index
    %c0_99 = arith.constant 0 : index
    %281 = vector.load %arg11[%c0_98, %c0_99] : memref<8x128xf32, #tpu.memory_space<vmem>>, vector<8x128xf32>
    tpu.vector_store %arg11[%c0_98, %c0_99], %276 {strides = array<i32>} : memref<8x128xf32, #tpu.memory_space<vmem>>, vector<8x128xf32>,
    %c0_100 = arith.constant 0 : index
    %c0_101 = arith.constant 0 : index
    %282 = vector.load %arg12[%c0_100, %c0_101] : memref<8x128xf32, #tpu.memory_space<vmem>>, vector<8x128xf32>
    tpu.vector_store %arg12[%c0_100, %c0_101], %280 {strides = array<i32>} : memref<8x128xf32, #tpu.memory_space<vmem>>, vector<8x128xf32>,
    %c0_i32_102 = arith.constant 0 : i32
    %283 = arith.cmpi eq, %arg0, %c0_i32_102 : i32
    %284 = arith.extui %283 : i1 to i32
    %c0_i32_103 = arith.constant 0 : i32
    %285 = arith.cmpi ne, %284, %c0_i32_103 : i32
    scf.if %285 {
      %c0_104 = arith.constant 0 : index
      %c0_105 = arith.constant 0 : index
      %286 = vector.load %arg12[%c0_104, %c0_105] : memref<8x128xf32, #tpu.memory_space<vmem>>, vector<8x128xf32>
      %c0_106 = arith.constant 0 : index
      %c0_107 = arith.constant 0 : index
      %287 = vector.load %arg8[%c0_106, %c0_107] : memref<128x128xf32, #tpu.memory_space<vmem>>, vector<128x128xf32>
      %cst_108 = arith.constant dense<0.000000e+00> : vector<8x128xf32>
      %288 = tpu.matmul %286, %287, %cst_108 {dimension_numbers = #tpu.dot_dimension_numbers<[1], [0], [0], [1], [0, 0, 1, 1], [], []>} : vector<8x128xf32>, vector<128x128xf32>, vector<8x128xf32> -> vector<8x128xf32>
      %c0_109 = arith.constant 0 : index
      %c0_110 = arith.constant 0 : index
      %289 = vector.load %arg9[%c0_109, %c0_110] : memref<1x128xf32, #tpu.memory_space<vmem>>, vector<1x128xf32>
      %290 = vector.broadcast %289 : vector<1x128xf32> to vector<8x128xf32>
      %291 = arith.addf %288, %290 : vector<8x128xf32>
      %c0_111 = arith.constant 0 : index
      %c0_112 = arith.constant 0 : index
      %292 = vector.load %arg10[%c0_111, %c0_112] : memref<8x128xf32, #tpu.memory_space<vmem>>, vector<8x128xf32>
      tpu.vector_store %arg10[%c0_111, %c0_112], %291 {strides = array<i32>} : memref<8x128xf32, #tpu.memory_space<vmem>>, vector<8x128xf32>,
    } else {
    }
    return
  }
  func.func @transform_0(%arg0: i32) -> (i32, i32) {
    %c0_i32 = arith.constant 0 : i32
    %c0_i32_0 = arith.constant 0 : i32
    return %arg0, %c0_i32 : i32, i32
  }
  func.func @transform_1(%arg0: i32) -> (i32, i32) {
    %c0_i32 = arith.constant 0 : i32
    %c0_i32_0 = arith.constant 0 : i32
    %c0_i32_1 = arith.constant 0 : i32
    return %c0_i32, %c0_i32_0 : i32, i32
  }
  func.func @transform_2(%arg0: i32) -> (i32, i32) {
    %c0_i32 = arith.constant 0 : i32
    %c0_i32_0 = arith.constant 0 : i32
    %c0_i32_1 = arith.constant 0 : i32
    return %c0_i32, %c0_i32_0 : i32, i32
  }
  func.func @transform_3(%arg0: i32) -> (i32, i32) {
    %c0_i32 = arith.constant 0 : i32
    %c0_i32_0 = arith.constant 0 : i32
    %c0_i32_1 = arith.constant 0 : i32
    return %c0_i32, %c0_i32_0 : i32, i32
  }
  func.func @transform_4(%arg0: i32) -> (i32, i32) {
    %c0_i32 = arith.constant 0 : i32
    %c0_i32_0 = arith.constant 0 : i32
    %c0_i32_1 = arith.constant 0 : i32
    return %c0_i32, %c0_i32_0 : i32, i32
  }
  func.func @transform_5(%arg0: i32) -> (i32, i32) {
    %c0_i32 = arith.constant 0 : i32
    %c0_i32_0 = arith.constant 0 : i32
    %c0_i32_1 = arith.constant 0 : i32
    return %c0_i32, %c0_i32_0 : i32, i32
  }
  func.func @transform_6(%arg0: i32) -> (i32, i32) {
    %c0_i32 = arith.constant 0 : i32
    %c0_i32_0 = arith.constant 0 : i32
    %c0_i32_1 = arith.constant 0 : i32
    return %c0_i32, %c0_i32_0 : i32, i32
  }
  func.func @transform_7(%arg0: i32) -> (i32, i32) {
    %c0_i32 = arith.constant 0 : i32
    %c0_i32_0 = arith.constant 0 : i32
    %c0_i32_1 = arith.constant 0 : i32
    return %c0_i32, %c0_i32_0 : i32, i32
  }
  func.func @transform_8(%arg0: i32) -> (i32, i32) {
    %c0_i32 = arith.constant 0 : i32
    %c0_i32_0 = arith.constant 0 : i32
    %c0_i32_1 = arith.constant 0 : i32
    return %c0_i32, %c0_i32_0 : i32, i32
  }
  func.func @transform_9(%arg0: i32) -> (i32, i32) {
    %c0_i32 = arith.constant 0 : i32
    %c0_i32_0 = arith.constant 0 : i32
    %c0_i32_1 = arith.constant 0 : i32
    return %c0_i32, %c0_i32_0 : i32, i32
  }
}

</mosaic_0001>

<bundles_post_ra>
// kernel: tpu_custom_call.1
= control target key start
LH: loop header
LB: loop body
LE: loop exit
PB: predicated region body
PF: predicated region fallthrough
CT: control target
= control target key end

     0   :  { %14 = vsyncpa [#allocation6], 0  ;;  %s3019_s0 = inlined_call_operand.hbm [shape: bf16[64,128], index: 0, kind: input, shape index: {}]   ;;  %s3020_s1 = inlined_call_operand.vmem [shape: s32[8,1], index: 1, kind: input, shape index: {}]   ;;  %s3021_s2 = inlined_call_operand.hbm [shape: bf16[128,384], index: 2, kind: input, shape index: {}]   ;;  %s3022_s3 = inlined_call_operand.hbm [shape: bf16[128,256], index: 3, kind: input, shape index: {}]   ;;  %s3023_s4 = inlined_call_operand.hbm [shape: bf16[128,128], index: 4, kind: input, shape index: {}]   ;;  %s3024_s5 = inlined_call_operand.vmem [shape: f32[1,384], index: 5, kind: input, shape index: {}]   ;;  %s3025_s6 = inlined_call_operand.vmem [shape: f32[1,128], index: 6, kind: input, shape index: {}]   ;;  %s3026_s7 = inlined_call_operand.hbm [shape: f32[128,128], index: 7, kind: input, shape index: {}]   ;;  %s3027_s8 = inlined_call_operand.vmem [shape: f32[1,128], index: 8, kind: input, shape index: {}]   ;;  %s3028_s9 = inlined_call_operand.hbm [shape: f32[8,128], index: 9, kind: output, shape index: {}]  }
   0x1   :  { %15 = vsyncpa [#allocation9], 0 }
   0x2   :  { %16 = vsyncpa [#allocation12], 0 }
   0x3   :  { %17 = vsyncpa [#allocation7], 0  ;;  %s2419_s30 = smov [#allocation8]   ;;  %s2279_s13 = scalar_lea.hbm %s3021_s2, 3072 }
   0x4   :  { %s37_s10 = sshll.u32 %s2419_s30, 4  ;;  %p2280_p0 = scmp.ne.s32.totalorder %s3021_s2, %s2279_s13  ;;  %s38_s10 = int_to_ptr.vmem [resolvable:$true] %s37_s10 }
   0x5   :  { %p2283_p1 = scmp.lt.u32.totalorder %s2279_s13, %s3021_s2 }
   0x7   :  { %p2285_p2 = pnand %p2283_p1, %p2280_p0 }
   0x9   :  { %2288 = shalt.err (!%p2285_p2)
}
   0xa   :  { %s2289_s18 = scalar_lea.vmem %s38_s10, 3072  ;;  %p2294_p4 = scmp.lt.s32.totalorder %s38_s10, %s38_s10 }
   0xb   :  { %p2290_p3 = scmp.ne.s32.totalorder %s38_s10, %s2289_s18  ;;  %p2295_p5 = scmp.lt.s32.totalorder %s2289_s18, %s2289_s18 }
   0xd   :  { %p2296_p6 = por %p2295_p5, %p2294_p4 }
   0xf   :  { %p2297_p7 = pnand %p2296_p6, %p2290_p3 }
  0x11   :  { %2300 = shalt.err (!%p2297_p7)
}
  0x12   :  { %s2420_s19 = smov 192   ;;  %s2421_s20 = smov 12  }
  0x13   :  { %43 = dma.hbm_to_vmem [thread:$0]  %s3021_s2, 3072, %s38_s10, [#allocation9], %s2420_s19, %s2420_s19, %s2421_s20  }
  0x14   :  { %s2422_s23 = smov [#allocation11]   ;;  %s2423_s25 = smov [#allocation5]  }
  0x15   :  { %s61_s24 = sshll.u32 %s2422_s23, 4  ;;  %s23_s26 = sshll.u32 %s2423_s25, 4  ;;  %s62_s24 = int_to_ptr.vmem [resolvable:$true] %s61_s24  ;;  %s24_s26 = int_to_ptr.vmem [resolvable:$true] %s23_s26 }
  0x16   :  { %s2301_s29 = scalar_lea.hbm %s3023_s4, 1024 }
  0x17   :  { %p2302_p8 = scmp.ne.s32.totalorder %s3023_s4, %s2301_s29  ;;  %p2305_p9 = scmp.lt.u32.totalorder %s2301_s29, %s3023_s4 }
  0x19   :  { %p2307_p10 = pnand %p2305_p9, %p2302_p8 }
  0x1b   :  { %2310 = shalt.err (!%p2307_p10)
}
  0x1c   :  { %s2311_s2 = scalar_lea.vmem %s62_s24, 1024  ;;  %p2316_p12 = scmp.lt.s32.totalorder %s62_s24, %s62_s24 }
  0x1d   :  { %p2312_p11 = scmp.ne.s32.totalorder %s62_s24, %s2311_s2  ;;  %p2317_p13 = scmp.lt.s32.totalorder %s2311_s2, %s2311_s2 }
  0x1f   :  { %p2318_p0 = por %p2317_p13, %p2316_p12 }
  0x21   :  { %p2319_p1 = pnand %p2318_p0, %p2312_p11 }
  0x23   :  { %2322 = shalt.err (!%p2319_p1)
}
  0x24   :  { %s2424_s10 = smov 64   ;;  %s2425_s14 = smov 4  }
  0x25   :  { %67 = dma.hbm_to_vmem [thread:$0]  %s3023_s4, 1024, %s62_s24, [#allocation12], %s2424_s10, %s2424_s10, %s2425_s14  }
  0x26   :  { %s2323_s19 = scalar_lea.hbm %s3019_s0, 512 }
  0x27   :  { %p2324_p2 = scmp.ne.s32.totalorder %s3019_s0, %s2323_s19  ;;  %p2327_p3 = scmp.lt.u32.totalorder %s2323_s19, %s3019_s0 }
  0x29   :  { %p2329_p4 = pnand %p2327_p3, %p2324_p2 }
  0x2b   :  { %2332 = shalt.err (!%p2329_p4)
}
  0x2c   :  { %s2333_s25 = scalar_lea.vmem %s24_s26, 512  ;;  %p2338_p6 = scmp.lt.s32.totalorder %s24_s26, %s24_s26 }
  0x2d   :  { %p2334_p5 = scmp.ne.s32.totalorder %s24_s26, %s2333_s25  ;;  %p2339_p7 = scmp.lt.s32.totalorder %s2333_s25, %s2333_s25 }
  0x2f   :  { %p2340_p8 = por %p2339_p7, %p2338_p6 }
  0x31   :  { %p2341_p9 = pnand %p2340_p8, %p2334_p5 }
  0x33   :  { %2344 = shalt.err (!%p2341_p9)
}
  0x34   :  { %29 = dma.hbm_to_vmem [thread:$0]  %s3019_s0, 512, %s24_s26, [#allocation6], %s2424_s10, %s2424_s10, %s2425_s14  }
  0x35   :  { %s2426_s27 = smov [#allocation10]   ;;  %s2345_s11 = scalar_lea.hbm %s3022_s3, 2048 }
  0x36   :  { %s49_s28 = sshll.u32 %s2426_s27, 4  ;;  %p2346_p10 = scmp.ne.s32.totalorder %s3022_s3, %s2345_s11  ;;  %s50_s28 = int_to_ptr.vmem [resolvable:$true] %s49_s28 }
  0x37   :  { %p2349_p11 = scmp.lt.u32.totalorder %s2345_s11, %s3022_s3 }
  0x39   :  { %p2351_p12 = pnand %p2349_p11, %p2346_p10 }
  0x3b   :  { %2354 = shalt.err (!%p2351_p12)
}
  0x3c   :  { %s2355_s16 = scalar_lea.vmem %s50_s28, 2048  ;;  %p2360_p0 = scmp.lt.s32.totalorder %s50_s28, %s50_s28 }
  0x3d   :  { %p2356_p13 = scmp.ne.s32.totalorder %s50_s28, %s2355_s16  ;;  %p2361_p1 = scmp.lt.s32.totalorder %s2355_s16, %s2355_s16 }
  0x3f   :  { %p2362_p2 = por %p2361_p1, %p2360_p0 }
  0x41   :  { %p2363_p3 = pnand %p2362_p2, %p2356_p13 }
  0x43   :  { %2366 = shalt.err (!%p2363_p3)
}
  0x44   :  { %s2427_s0 = smov 128   ;;  %s2428_s26 = smov 8  }
  0x45   :  { %55 = dma.hbm_to_vmem [thread:$0]  %s3022_s3, 2048, %s50_s28, [#allocation9], %s2427_s0, %s2427_s0, %s2428_s26  }
  0x46   :  { %s2429_s17 = smov [#allocation13]   ;;  %s2367_s21 = scalar_lea.hbm %s3026_s7, 2048 }
  0x47   :  { %s77_s18 = sshll.u32 %s2429_s17, 4  ;;  %p2368_p4 = scmp.ne.s32.totalorder %s3026_s7, %s2367_s21  ;;  %s78_s18 = int_to_ptr.vmem [resolvable:$true] %s77_s18 }
  0x48   :  { %p2371_p5 = scmp.lt.u32.totalorder %s2367_s21, %s3026_s7 }
  0x4a   :  { %p2373_p6 = pnand %p2371_p5, %p2368_p4 }
  0x4c   :  { %2376 = shalt.err (!%p2373_p6)
}
  0x4d   :  { %s2377_s24 = scalar_lea.vmem %s78_s18, 2048  ;;  %p2382_p8 = scmp.lt.s32.totalorder %s78_s18, %s78_s18 }
  0x4e   :  { %p2378_p7 = scmp.ne.s32.totalorder %s78_s18, %s2377_s24  ;;  %p2383_p9 = scmp.lt.s32.totalorder %s2377_s24, %s2377_s24 }
  0x50   :  { %p2384_p10 = por %p2383_p9, %p2382_p8 }
  0x52   :  { %p2385_p11 = pnand %p2384_p10, %p2378_p7 }
  0x54   :  { %2388 = shalt.err (!%p2385_p11)
}
  0x55   :  { %83 = dma.hbm_to_vmem [thread:$0]  %s3026_s7, 2048, %s78_s18, [#allocation12], %s2427_s0, %s2427_s0, %s2428_s26  }
  0x56   :  { %2411 = dma.done.wait [#allocation6], 512  }
  0x57   :  { %2412 = vsyncadd [#allocation6], 4294966784 }
  0x58   :  { %2413 = dma.done.wait [#allocation9], 5120  }
  0x59   :  { %2414 = vsyncadd [#allocation9], 4294962176 }
  0x5a   :  { %2415 = dma.done.wait [#allocation12], 3072  }
  0x5b   :  { %2416 = vsyncadd [#allocation12], 4294964224  ;;  %v3031_v0 = vmov 0   ;;  %v2111_v1 = vld [vmem:[#allocation8 + $0x4] ss:$12 sps:$4 sm:$0xff]   ;;  %v2146_v31 = vld [vmem:[#allocation5 + $0x8] sm:$0xff]   ;;  %v150_v56 = vlaneseq }
  0x5c   :  { %349 = vmatprep.mubr.bf16.mxu0 %v3031_v0  ;;  %2110 = vset.pattern.permute.xlu0 %v3031_v0  ;;  %v2113_v2 = vld [vmem:[#allocation8] ss:$12 sps:$4 sm:$0xff]   ;;  %v2114_v3 = vld [vmem:[#allocation8 + $0x1c] ss:$12 sps:$4 sm:$0xff]   ;;  %v2116_v4 = vld [vmem:[#allocation8 + $0x18] ss:$12 sps:$4 sm:$0xff]  }
  0x5d   :  { %317 = vmatprep.subr.bf16.mxu0 %v2111_v1  ;;  %v2117_v5 = vld [vmem:[#allocation8 + $0x34] ss:$12 sps:$4 sm:$0xff]   ;;  %v2119_v6 = vld [vmem:[#allocation8 + $0x30] ss:$12 sps:$4 sm:$0xff]   ;;  %v2120_v7 = vld [vmem:[#allocation8 + $0x4c] ss:$12 sps:$4 sm:$0xff]  }
  0x5e   :  { %318 = vmatpush1.bf16.msra.mxu0 %v2113_v2  ;;  %v2131_v8 = vld [vmem:[#allocation8 + $0x8] ss:$12 sps:$4 sm:$0xff]   ;;  %v2123_v10 = vld [vmem:[#allocation8 + $0x64] ss:$12 sps:$4 sm:$0xff]   ;;  %v2135_v11 = vld [vmem:[#allocation8 + $0x20] ss:$12 sps:$4 sm:$0xff]  }
  0x5f   :  { %319 = vmatprep.subr.bf16.mxu0 %v2114_v3  ;;  %v2122_v9 = vld [vmem:[#allocation8 + $0x48] ss:$12 sps:$4 sm:$0xff]   ;;  %1851 = vmatprep.subr.bf16.mxu1 %v2131_v8  ;;  %v2137_v12 = vld [vmem:[#allocation5] sm:$0xff]   ;;  %v2142_v16 = vld [vmem:[#allocation8 + $0x50] ss:$12 sps:$4 sm:$0xff]   ;;  %v3033_v34 = vmov 0.0  }
  0x60   :  { %1852 = vmatpush3.bf16.msra.mxu1 %v2131_v8  ;;  %v2138_v13 = vld [vmem:[#allocation8 + $0x38] ss:$12 sps:$4 sm:$0xff]   ;;  %v2125_v14 = vld [vmem:[#allocation8 + $0x60] ss:$12 sps:$4 sm:$0xff]   ;;  %1867 = vmatprep.mubr.bf16.mxu1 %v2137_v12  ;;  %v2126_v15 = vld [vmem:[#allocation8 + $0x7c] ss:$12 sps:$4 sm:$0xff]  }
  0x61   :  { %1853 = vmatprep.subr.bf16.mxu1 %v2135_v11  ;;  %v2128_v17 = vld [vmem:[#allocation8 + $0x78] ss:$12 sps:$4 sm:$0xff]   ;;  %v2129_v18 = vld [vmem:[#allocation8 + $0x94] ss:$12 sps:$4 sm:$0xff]   ;;  %v2132_v20 = vld [vmem:[#allocation8 + $0x90] ss:$12 sps:$4 sm:$0xff]  }
  0x62   :  { %320 = vmatpush1.bf16.msra.mxu0 %v2116_v4  ;;  %v2147_v19 = vld [vmem:[#allocation8 + $0x68] ss:$12 sps:$4 sm:$0xff]   ;;  %v2133_v21 = vld [vmem:[#allocation8 + $0xac] ss:$12 sps:$4 sm:$0xff]   ;;  %v2160_v28 = vld [vmem:[#allocation8 + $0xb0] ss:$12 sps:$4 sm:$0xff]  }
  0x63   :  { %321 = vmatprep.subr.bf16.mxu0 %v2117_v5  ;;  %v2151_v22 = vld [vmem:[#allocation8 + $0x80] ss:$12 sps:$4 sm:$0xff]   ;;  %v2136_v23 = vld [vmem:[#allocation8 + $0xa8] ss:$12 sps:$4 sm:$0xff]   ;;  %v2156_v25 = vld [vmem:[#allocation8 + $0x98] ss:$12 sps:$4 sm:$0xff]  }
  0x64   :  { %1854 = vmatpush3.bf16.msra.mxu1 %v2135_v11  ;;  %v2547_v24 = vld [vmem:[#allocation10 + $0x4] ss:$8 sps:$4 sm:$0xff]   ;;  %v2549_v26 = vld [vmem:[#allocation10] ss:$8 sps:$4 sm:$0xff]   ;;  %v2552_v27 = vld [vmem:[#allocation10 + $0x14] ss:$8 sps:$4 sm:$0xff]  }
  0x65   :  { %1855 = vmatprep.subr.bf16.mxu1 %v2138_v13  ;;  %v2555_v29 = vld [vmem:[#allocation10 + $0x10] ss:$8 sps:$4 sm:$0xff]   ;;  %v2559_v30 = vld [vmem:[#allocation10 + $0x24] ss:$8 sps:$4 sm:$0xff]   ;;  %v2562_v32 = vld [vmem:[#allocation10 + $0x20] ss:$8 sps:$4 sm:$0xff]  }
  0x66   :  { %322 = vmatpush1.bf16.msra.mxu0 %v2119_v6  ;;  %v2565_v33 = vld [vmem:[#allocation10 + $0x34] ss:$8 sps:$4 sm:$0xff]   ;;  %v2568_v35 = vld [vmem:[#allocation11] sm:$0xff]   ;;  %v2574_v37 = vld [vmem:[#allocation10 + $0x30] ss:$8 sps:$4 sm:$0xff]   ;;  %vm2432_vm0 = vmmov 0  }
  0x67   :  { %323 = vmatprep.subr.bf16.mxu0 %v2120_v7  ;;  %v479_v36 = vld [vmem:[%s3020_s1] sm:$0xff]  ;;  %v2155_v38 = vld [vmem:[#allocation5 + $0x10] sm:$0xff]   ;;  %v2581_v40 = vld [vmem:[#allocation11 + $0x8] sm:$0xff]   ;;  %v3029_v54 = vmov 0.0|0.0   ;;  %v151_v57 = vshrl.u32 %v150_v56, 7  ;;  %s2434_s12 = smov [#allocation14]  }
  0x68   :  { %1856 = vmatpush3.bf16.msra.mxu1 %v2138_v13  ;;  %481 = vperm.xlu0 %2110, %v479_v36   ;;  %v2578_v39 = vld [vmem:[#allocation10 + $0x44] ss:$8 sps:$4 sm:$0xff]   ;;  %v2585_v41 = vld [vmem:[#allocation10 + $0x40] ss:$8 sps:$4 sm:$0xff]   ;;  %v2588_v42 = vld [vmem:[#allocation10 + $0x54] ss:$8 sps:$4 sm:$0xff]  }
  0x69   :  { %1857 = vmatprep.subr.bf16.mxu1 %v2142_v16  ;;  %v2591_v43 = vld [vmem:[#allocation11 + $0x10] sm:$0xff]   ;;  %v2164_v44 = vld [vmem:[#allocation5 + $0x18] sm:$0xff]   ;;  %v2599_v46 = vld [vmem:[#allocation10 + $0x64] ss:$8 sps:$4 sm:$0xff]   ;;  %v152_v58 = vsub.s32 0, %v151_v57  ;;  %v156_v60 = vsub.s32 1, %v151_v57 }
  0x6a   :  { %324 = vmatpush1.bf16.msra.mxu0 %v2122_v9  ;;  %v2595_v45 = vld [vmem:[#allocation10 + $0x50] ss:$8 sps:$4 sm:$0xff]   ;;  %v2608_v48 = vld [vmem:[#allocation10 + $0x60] ss:$8 sps:$4 sm:$0xff]   ;;  %v2611_v49 = vld [vmem:[#allocation10 + $0x74] ss:$8 sps:$4 sm:$0xff]  }
  0x6b   :  { %325 = vmatprep.subr.bf16.mxu0 %v2123_v10  ;;  %v2602_v47 = vld [vmem:[#allocation11 + $0x18] sm:$0xff]   ;;  %v2614_v50 = vld [vmem:[#allocation11 + $0x20] sm:$0xff]   ;;  %v2623_v52 = vld [vmem:[#allocation11 + $0x28] sm:$0xff]   ;;  %v160_v5 = vsub.s32 2, %v151_v57  ;;  %s1662_s13 = sshll.u32 %s2434_s12, 4  ;;  %s1663_s13 = int_to_ptr.vmem [resolvable:$true] %s1662_s13 }
  0x6c   :  { %1858 = vmatpush3.bf16.msra.mxu1 %v2142_v16  ;;  %v2618_v51 = vld [vmem:[#allocation10 + $0x70] ss:$8 sps:$4 sm:$0xff]   ;;  %v148_v59 = vld [vmem:[%s3024_s5] sm:$0x7]  ;;  %s2389_s2 = scalar_lea.vmem %s1663_s13, 128  ;;  %p2394_p13 = scmp.lt.s32.totalorder %s1663_s13, %s1663_s13 }
  0x6d   :  { %1859 = vmatprep.subr.bf16.mxu1 %v2147_v19  ;;  %v2629_v53 = vld [vmem:[#allocation11 + $0x30] sm:$0xff]   ;;  %v2637_v55 = vld [vmem:[#allocation11 + $0x38] sm:$0xff]   ;;  %v153_v62 = vrot.slane %v148_v59, %v152_v58  ;;  %v157_v1 = vrot.slane %v148_v59, %v156_v60  ;;  %v2682_v7 = vrot.slane %v148_v59, %v160_v5  ;;  %p2390_p12 = scmp.ne.s32.totalorder %s1663_s13, %s2389_s2  ;;  %p2395_p0 = scmp.lt.s32.totalorder %s2389_s2, %s2389_s2 }
  0x6e   :  { %326 = vmatpush1.bf16.msra.mxu0 %v2125_v14 }
  0x6f   :  { %327 = vmatprep.subr.bf16.mxu0 %v2126_v15  ;;  %p2396_p1 = por %p2395_p0, %p2394_p13 }
  0x70   :  { %1860 = vmatpush3.bf16.msra.mxu1 %v2147_v19 }
  0x71   :  { %1861 = vmatprep.subr.bf16.mxu1 %v2151_v22  ;;  %p2397_p2 = pnand %p2396_p1, %p2390_p12 }
  0x72   :  { %328 = vmatpush1.bf16.msra.mxu0 %v2128_v17 }
  0x73   :  { %329 = vmatprep.subr.bf16.mxu0 %v2129_v18 }
  0x74   :  { %1862 = vmatpush3.bf16.msra.mxu1 %v2151_v22 }
  0x75   :  { %1863 = vmatprep.subr.bf16.mxu1 %v2156_v25 }
  0x76   :  { %330 = vmatpush1.bf16.msra.mxu0 %v2132_v20 }
  0x77   :  { %331 = vmatprep.subr.bf16.mxu0 %v2133_v21 }
  0x78   :  { %1864 = vmatpush3.bf16.msra.mxu1 %v2156_v25 }
  0x79   :  { %1865 = vmatprep.subr.bf16.mxu1 %v2160_v28 }
  0x7a   :  { %332 = vmatpush1.bf16.msra.mxu0 %v2136_v23 }
  0x7b   :  { %590 = vmatprep.subr.bf16.mxu0 %v2547_v24 }
  0x7c   :  { %1866 = vmatpush3.bf16.msra.mxu1 %v2160_v28 }
  0x7d   :  { %350 = vmatmul.mubr.bf16.vlgmr.msra.gmra.mrb[0].mxu0 %v2137_v12  ;;  %1875 = vmatprep.subr.bf16.mxu1 %v3033_v34 }
  0x7e   :  { %591 = vmatpush1.bf16.msra.mxu0 %v2549_v26  ;;  %359 = vmatprep.mubr.bf16.mxu0 %v3031_v0 }
  0x7f   :  { %592 = vmatprep.subr.bf16.mxu0 %v2552_v27  ;;  %1868 = vmatmul.mubr.bf16.vlgmr.msra.gmra.mrb[0].mxu1 %v2146_v31 }
  0x80   :  { %1876 = vmatpush3.bf16.msra.mxu1 %v2568_v35  ;;  %1871 = vmatprep.mubr.bf16.mxu1 %v2155_v38 }
  0x81   :  { %1877 = vmatprep.subr.bf16.mxu1 %v3033_v34 }
  0x82   :  { %593 = vmatpush1.bf16.msra.mxu0 %v2555_v29 }
  0x83   :  { %594 = vmatprep.subr.bf16.mxu0 %v2559_v30 }
  0x84   :  { %1878 = vmatpush3.bf16.msra.mxu1 %v2581_v40 }
  0x85   :  { %360 = vmatmul.mubr.bf16.gmra.mrb[4].mxu0 %v2146_v31  ;;  %1879 = vmatprep.subr.bf16.mxu1 %v3033_v34 }
  0x86   :  { %595 = vmatpush1.bf16.msra.mxu0 %v2562_v32  ;;  %369 = vmatprep.mubr.bf16.mxu0 %v3031_v0 }
  0x87   :  { %596 = vmatprep.subr.bf16.mxu0 %v2565_v33  ;;  %1872 = vmatmul.mubr.bf16.gmra.mrb[4].mxu1 %v2164_v44 }
  0x88   :  { %1880 = vmatpush3.bf16.msra.mxu1 %v2591_v43  ;;  %1891 = vmatprep.mubr.msk.bf16.mxu1 %vm2432_vm0, %v3033_v34 }
  0x89   :  { %1881 = vmatprep.subr.bf16.mxu1 %v3033_v34 }
  0x8a   :  { %597 = vmatpush1.bf16.msra.mxu0 %v2574_v37 }
  0x8b   :  { %598 = vmatprep.subr.bf16.mxu0 %v2578_v39 }
  0x8c   :  { %1882 = vmatpush3.bf16.msra.mxu1 %v2602_v47 }
  0x8d   :  { %370 = vmatmul.mubr.bf16.gmra.mrb[8].mxu0 %v2155_v38  ;;  %1883 = vmatprep.subr.bf16.mxu1 %v3033_v34 }
  0x8e   :  { %599 = vmatpush1.bf16.msra.mxu0 %v2585_v41  ;;  %379 = vmatprep.mubr.bf16.mxu0 %v3031_v0 }
  0x8f   :  { %600 = vmatprep.subr.bf16.mxu0 %v2588_v42 }
  0x90   :  { %1884 = vmatpush3.bf16.msra.mxu1 %v2614_v50 }
  0x91   :  { %1885 = vmatprep.subr.bf16.mxu1 %v3033_v34 }
  0x92   :  { %601 = vmatpush1.bf16.msra.mxu0 %v2595_v45 }
  0x93   :  { %602 = vmatprep.subr.bf16.mxu0 %v2599_v46 }
  0x94   :  { %1886 = vmatpush3.bf16.msra.mxu1 %v2623_v52 }
  0x95   :  { %380 = vmatmul.mubr.bf16.gmra.mrb[12].mxu0 %v2164_v44  ;;  %1887 = vmatprep.subr.bf16.mxu1 %v3033_v34 }
  0x96   :  { %603 = vmatpush1.bf16.msra.mxu0 %v2608_v48  ;;  %622 = vmatprep.mubr.bf16.mxu0 %v3031_v0 }
  0x97   :  { %604 = vmatprep.subr.bf16.mxu0 %v2611_v49 }
  0x98   :  { %1888 = vmatpush3.bf16.msra.mxu1 %v2629_v53 }
  0x99   :  { %1889 = vmatprep.subr.bf16.mxu1 %v3033_v34 }
  0x9a   :  { %605 = vmatpush1.bf16.msra.mxu0 %v2618_v51 }
  0x9b   :  { %772 = vmatprep.subr.bf16.mxu0 %v2547_v24 }
  0x9c   :  { %1890 = vmatpush3.bf16.msra.mxu1 %v2637_v55 }
  0x9d   :  { %623 = vmatmul.mubr.bf16.vlgmr.msra.gmra.mrb[16].mxu0 %v3029_v54  ;;  %1895 = vmatprep.subr.bf16.mxu1 %v3033_v34 }
  0x9e   :  { %773 = vmatpush1.bf16.msra.mxu0 %v2549_v26  ;;  %804 = vmatprep.mubr.bf16.mxu0 %v3031_v0 }
  0x9f   :  { %774 = vmatprep.subr.bf16.mxu0 %v2552_v27  ;;  %1892 = vmatmul.mubr.bf16.vlgmr.msra.gmra.mrb[8].mxu1 %v3029_v54 }
  0xa0   :  { %1896 = vmatpush3.bf16.msra.mxu1 %v2568_v35  ;;  %1911 = vmatprep.mubr.msk.bf16.mxu1 %vm2432_vm0, %v3033_v34 }
  0xa1   :  { %1897 = vmatprep.subr.bf16.mxu1 %v3033_v34 }
  0xa2   :  { %775 = vmatpush1.bf16.msra.mxu0 %v2555_v29 }
  0xa3   :  { %776 = vmatprep.subr.bf16.mxu0 %v2559_v30 }
  0xa4   :  { %1898 = vmatpush3.bf16.msra.mxu1 %v2581_v40 }
  0xa5   :  { %1899 = vmatprep.subr.bf16.mxu1 %v3033_v34 }
  0xa6   :  { %777 = vmatpush1.bf16.msra.mxu0 %v2562_v32 }
  0xa7   :  { %778 = vmatprep.subr.bf16.mxu0 %v2565_v33 }
  0xa8   :  { %1900 = vmatpush3.bf16.msra.mxu1 %v2591_v43 }
  0xa9   :  { %1901 = vmatprep.subr.bf16.mxu1 %v3033_v34 }
  0xaa   :  { %779 = vmatpush1.bf16.msra.mxu0 %v2574_v37 }
  0xab   :  { %780 = vmatprep.subr.bf16.mxu0 %v2578_v39 }
  0xac   :  { %1902 = vmatpush3.bf16.msra.mxu1 %v2602_v47 }
  0xad   :  { %1903 = vmatprep.subr.bf16.mxu1 %v3033_v34 }
  0xae   :  { %781 = vmatpush1.bf16.msra.mxu0 %v2585_v41 }
  0xaf   :  { %782 = vmatprep.subr.bf16.mxu0 %v2588_v42 }
  0xb0   :  { %1904 = vmatpush3.bf16.msra.mxu1 %v2614_v50 }
  0xb1   :  { %1905 = vmatprep.subr.bf16.mxu1 %v3033_v34 }
  0xb2   :  { %783 = vmatpush1.bf16.msra.mxu0 %v2595_v45 }
  0xb3   :  { %784 = vmatprep.subr.bf16.mxu0 %v2599_v46 }
  0xb4   :  { %1906 = vmatpush3.bf16.msra.mxu1 %v2623_v52 }
  0xb5   :  { %1907 = vmatprep.subr.bf16.mxu1 %v3033_v34 }
  0xb6   :  { %785 = vmatpush1.bf16.msra.mxu0 %v2608_v48 }
  0xb7   :  { %786 = vmatprep.subr.bf16.mxu0 %v2611_v49 }
  0xb8   :  { %1908 = vmatpush3.bf16.msra.mxu1 %v2629_v53 }
  0xb9   :  { %1909 = vmatprep.subr.bf16.mxu1 %v3033_v34 }
  0xba   :  { %787 = vmatpush1.bf16.msra.mxu0 %v2618_v51 }
  0xbb   :  { %885 = vmatprep.subr.bf16.mxu0 %v2547_v24 }
  0xbc   :  { %1910 = vmatpush3.bf16.msra.mxu1 %v2637_v55 }
  0xbd   :  { %1915 = vmatprep.subr.bf16.mxu1 %v3033_v34 }
 0x150   :  { %v351_v61 = vpop.f32.mrb[0].mxu0 }
 0x151   :  { %v353_v63 = vpop.f32.mrb[1].mxu0 }
 0x152   :  { %v355_v2 = vpop.f32.mrb[2].mxu0  ;;  %v1869_v13 = vpop.f32.mrb[0].mxu1 }
 0x153   :  { %v2678_v3 = vadd.f32 %v355_v2, %v153_v62  ;;  %v357_v4 = vpop.f32.mrb[3].mxu0  ;;  %v2691_v16 = vadd.f32 %v1869_v13, %v2682_v7  ;;  %v424_v17 = vpop.f32.mrb[1].mxu1 }
 0x154   :  { %v2680_v6 = vadd.f32 %v357_v4, %v157_v1  ;;  %v1870_v19 = vpop.f32.mrb[2].mxu1 }
 0x155   :  { %v2696_v20 = vadd.f32 %v1870_v19, %v2682_v7  ;;  %v427_v21 = vpop.f32.mrb[3].mxu1 }
 0x156   :  { %v2699_v22 = vadd.f32 %v427_v21, %v2682_v7 }
 0x158   :  { %v361_v8 = vpop.f32.mrb[4].mxu0 }
 0x159   :  { %v2684_v9 = vadd.f32 %v361_v8, %v153_v62  ;;  %v363_v10 = vpop.f32.mrb[5].mxu0 }
 0x15a   :  { %v2686_v11 = vadd.f32 %v363_v10, %v157_v1  ;;  %v365_v12 = vpop.f32.mrb[6].mxu0  ;;  %v1873_v38 = vpop.f32.mrb[4].mxu1 }
 0x15b   :  { %v2688_v14 = vadd.f32 %v365_v12, %v153_v62  ;;  %v367_v15 = vpop.f32.mrb[7].mxu0  ;;  %v2708_v57 = vadd.f32 %v1873_v38, %v2682_v7  ;;  %v440_v58 = vpop.f32.mrb[5].mxu1  ;;  %v354_v38 = vadd.f32 %v353_v63, %v157_v1 }
 0x15c   :  { %v2693_v18 = vadd.f32 %v367_v15, %v157_v1  ;;  %v2713_v60 = vadd.f32 %v440_v58, %v2682_v7  ;;  %v1874_v2 = vpop.f32.mrb[6].mxu1 }
 0x15d   :  { %3035 = vst [vmem:[#allocation19_spill] sm:$0xff] %v2708_v57  ;;  %v2716_v4 = vadd.f32 %v1874_v2, %v2682_v7  ;;  %v443_v5 = vpop.f32.mrb[7].mxu1 }
 0x15e   :  { %v2719_v8 = vadd.f32 %v443_v5, %v2682_v7 }
 0x15f   :  { %3036 = vst [vmem:[#allocation20_spill] sm:$0xff] %v2716_v4 }
 0x160   :  { %v371_v23 = vpop.f32.mrb[8].mxu0 }
 0x161   :  { %v2701_v25 = vadd.f32 %v371_v23, %v153_v62  ;;  %v373_v28 = vpop.f32.mrb[9].mxu0 }
 0x162   :  { %v2703_v31 = vadd.f32 %v373_v28, %v157_v1  ;;  %v375_v36 = vpop.f32.mrb[10].mxu0 }
 0x163   :  { %v2705_v44 = vadd.f32 %v375_v36, %v153_v62  ;;  %v377_v56 = vpop.f32.mrb[11].mxu0  ;;  %v352_v36 = vadd.f32 %v351_v61, %v153_v62  ;;  %v2732_v61 = vld [vmem:[%s3025_s6] ss:$0 sm:$0xff] }
 0x164   :  { %v2710_v59 = vadd.f32 %v377_v56, %v157_v1 }
 0x168   :  { %v381_v10 = vpop.f32.mrb[12].mxu0 }
 0x169   :  { %v2721_v12 = vadd.f32 %v381_v10, %v153_v62  ;;  %v383_v13 = vpop.f32.mrb[13].mxu0 }
 0x16a   :  { %v2723_v15 = vadd.f32 %v383_v13, %v157_v1  ;;  %v385_v19 = vpop.f32.mrb[14].mxu0 }
 0x16b   :  { %v2725_v21 = vadd.f32 %v385_v19, %v153_v62  ;;  %v387_v23 = vpop.f32.mrb[15].mxu0 }
 0x16c   :  { %3037 = vst [vmem:[#allocation21_spill] sm:$0xff] %v2723_v15  ;;  %v2727_v28 = vadd.f32 %v387_v23, %v157_v1 }
 0x16d   :  { %3038 = vst [vmem:[#allocation22_spill] sm:$0xff] %v2725_v21 }
 0x170   :  { %v624_v56 = vpop.f32.mrb[16].mxu0 }
 0x171   :  { %v741_v58 = vadd.f32 %v624_v56, %v352_v36  ;;  %v626_v2 = vpop.f32.mrb[17].mxu0 }
 0x172   :  { %v742_v54 = vadd.f32 %v626_v2, %v354_v38  ;;  %v628_v5 = vpop.f32.mrb[18].mxu0  ;;  %v735_v4 = vpop.f32.mrb[8].mxu1 }
 0x173   :  { %v1733_v0 = vmul.f32 -1.442695, %v741_v58  ;;  %v629_v34 = vpop.f32.mrb[19].mxu0  ;;  %v1893_v13 = vpop.f32.mrb[9].mxu1  ;;  %v736_v63 = vadd.f32 %v2732_v61, %v735_v4 }
 0x174   :  { %v1734_v10 = vmul.f32 -1.442695, %v742_v54  ;;  %v738_v57 = vpop.f32.mrb[10].mxu1 }
 0x175   :  { %2179 = vpow2.f32 %v1733_v0  ;;  %v1894_v19 = vpop.f32.mrb[11].mxu1  ;;  %v425_v0 = vadd.f32 %v424_v17, %v2682_v7  ;;  %v3039_v7 = vmov 0.0   ;;  %v3040_v17 = vmov 0  }
 0x176   :  { %2181 = vpow2.f32 %v1734_v10 }
 0x17f   :  { %v2180_v21 = vpop.eup %2179 }
 0x180   :  { %v749_v15 = vadd.f32 1.0, %v2180_v21  ;;  %v2182_v23 = vpop.eup %2181 }
 0x181   :  { %v750_v62 = vadd.f32 1.0, %v2182_v23 }
 0x182   :  { %2183 = vrcp.f32 %v749_v15 }
 0x183   :  { %2185 = vrcp.f32 %v750_v62 }
 0x18c   :  { %v2184_v34 = vpop.eup %2183 }
 0x18d   :  { %v755_v54 = vmul.f32 %v2184_v34, %v736_v63  ;;  %v2186_v57 = vpop.eup %2185 }
 0x18e   :  { %v758_v36 = vsub.f32 1.0, %v2186_v57  ;;  %v760_v38 = vmul.f32 0.0, %v2186_v57 }
 0x18f   :  { %v756_v1 = vadd.f32 %v755_v54, %v425_v0 }
 0x191   :  { %2187 = vtanh.f32 %v756_v1 }
 0x19b   :  { %v2188_v21 = vpop.eup %2187 }
 0x19c   :  { %v759_v15 = vmul.f32 %v2188_v21, %v758_v36 }
 0x19e   :  { %v2736_v56 = vadd.f32 %v760_v38, %v759_v15 }
 0x1a0   :  { %v771_v58 = vpack.c.bf16 %v2736_v56, %v2736_v56 }
 0x1a2   :  { %805 = vmatmul.mubr.bf16.vlgmr.msra.gmra.mrb[20].mxu0 %v771_v58  ;;  %1912 = vmatmul.mubr.bf16.vlgmr.msra.gmra.mrb[12].mxu1 %v771_v58 }
 0x1a3   :  { %886 = vmatpush1.bf16.msra.mxu0 %v2549_v26  ;;  %1916 = vmatpush3.bf16.msra.mxu1 %v2568_v35 }
 0x1a4   :  { %887 = vmatprep.subr.bf16.mxu0 %v2552_v27  ;;  %1917 = vmatprep.subr.bf16.mxu1 %v3039_v7 }
 0x1a5   :  { %917 = vmatprep.mubr.bf16.mxu0 %v3040_v17  ;;  %1931 = vmatprep.mubr.msk.bf16.mxu1 %vm2432_vm0, %v3039_v7 }
 0x1a7   :  { %888 = vmatpush1.bf16.msra.mxu0 %v2555_v29  ;;  %1918 = vmatpush3.bf16.msra.mxu1 %v2581_v40 }
 0x1a8   :  { %889 = vmatprep.subr.bf16.mxu0 %v2559_v30  ;;  %1919 = vmatprep.subr.bf16.mxu1 %v3039_v7 }
 0x1ab   :  { %890 = vmatpush1.bf16.msra.mxu0 %v2562_v32  ;;  %1920 = vmatpush3.bf16.msra.mxu1 %v2591_v43 }
 0x1ac   :  { %891 = vmatprep.subr.bf16.mxu0 %v2565_v33  ;;  %1921 = vmatprep.subr.bf16.mxu1 %v3039_v7 }
 0x1af   :  { %892 = vmatpush1.bf16.msra.mxu0 %v2574_v37  ;;  %1922 = vmatpush3.bf16.msra.mxu1 %v2602_v47 }
 0x1b0   :  { %893 = vmatprep.subr.bf16.mxu0 %v2578_v39  ;;  %1923 = vmatprep.subr.bf16.mxu1 %v3039_v7 }
 0x1b3   :  { %894 = vmatpush1.bf16.msra.mxu0 %v2585_v41  ;;  %1924 = vmatpush3.bf16.msra.mxu1 %v2614_v50 }
 0x1b4   :  { %895 = vmatprep.subr.bf16.mxu0 %v2588_v42  ;;  %1925 = vmatprep.subr.bf16.mxu1 %v3039_v7 }
 0x1b7   :  { %896 = vmatpush1.bf16.msra.mxu0 %v2595_v45  ;;  %1926 = vmatpush3.bf16.msra.mxu1 %v2623_v52 }
 0x1b8   :  { %897 = vmatprep.subr.bf16.mxu0 %v2599_v46  ;;  %1927 = vmatprep.subr.bf16.mxu1 %v3039_v7 }
 0x1bb   :  { %898 = vmatpush1.bf16.msra.mxu0 %v2608_v48  ;;  %1928 = vmatpush3.bf16.msra.mxu1 %v2629_v53 }
 0x1bc   :  { %899 = vmatprep.subr.bf16.mxu0 %v2611_v49  ;;  %1929 = vmatprep.subr.bf16.mxu1 %v3039_v7 }
 0x1bf   :  { %900 = vmatpush1.bf16.msra.mxu0 %v2618_v51  ;;  %1930 = vmatpush3.bf16.msra.mxu1 %v2637_v55 }
 0x1c0   :  { %998 = vmatprep.subr.bf16.mxu0 %v2547_v24  ;;  %1935 = vmatprep.subr.bf16.mxu1 %v3039_v7 }
 0x275   :  { %v806_v4 = vpop.f32.mrb[20].mxu0  ;;  %v847_v2 = vpop.f32.mrb[12].mxu1 }
 0x276   :  { %v853_v5 = vadd.f32 %v806_v4, %v2678_v3  ;;  %v808_v10 = vpop.f32.mrb[21].mxu0  ;;  %v1913_v13 = vpop.f32.mrb[13].mxu1  ;;  %v848_v15 = vadd.f32 %v2732_v61, %v847_v2 }
 0x277   :  { %v854_v19 = vadd.f32 %v808_v10, %v2680_v6  ;;  %v810_v23 = vpop.f32.mrb[22].mxu0  ;;  %v850_v62 = vpop.f32.mrb[14].mxu1 }
 0x278   :  { %v1735_v63 = vmul.f32 -1.442695, %v853_v5  ;;  %v811_v34 = vpop.f32.mrb[23].mxu0  ;;  %v1914_v0 = vpop.f32.mrb[15].mxu1 }
 0x279   :  { %v1736_v54 = vmul.f32 -1.442695, %v854_v19 }
 0x27a   :  { %2189 = vpow2.f32 %v1735_v63 }
 0x27b   :  { %2191 = vpow2.f32 %v1736_v54 }
 0x284   :  { %v2190_v1 = vpop.eup %2189 }
 0x285   :  { %v861_v57 = vadd.f32 1.0, %v2190_v1  ;;  %v2192_v36 = vpop.eup %2191 }
 0x286   :  { %v862_v21 = vadd.f32 1.0, %v2192_v36 }
 0x287   :  { %2193 = vrcp.f32 %v861_v57 }
 0x288   :  { %2195 = vrcp.f32 %v862_v21 }
 0x291   :  { %v2194_v3 = vpop.eup %2193 }
 0x292   :  { %v867_v38 = vmul.f32 %v2194_v3, %v848_v15  ;;  %v2196_v58 = vpop.eup %2195 }
 0x293   :  { %v870_v4 = vsub.f32 1.0, %v2196_v58  ;;  %v872_v13 = vmul.f32 %v2196_v58, %v2736_v56 }
 0x294   :  { %v868_v6 = vadd.f32 %v867_v38, %v2699_v22 }
 0x296   :  { %2197 = vtanh.f32 %v868_v6 }
 0x2a0   :  { %v2198_v5 = vpop.eup %2197 }
 0x2a1   :  { %v871_v10 = vmul.f32 %v2198_v5, %v870_v4 }
 0x2a3   :  { %v2780_v19 = vadd.f32 %v872_v13, %v871_v10 }
 0x2a5   :  { %v884_v23 = vpack.c.bf16 %v2780_v19, %v2780_v19 }
 0x2a7   :  { %918 = vmatmul.mubr.bf16.vlgmr.msra.gmra.mrb[24].mxu0 %v884_v23  ;;  %1932 = vmatmul.mubr.bf16.vlgmr.msra.gmra.mrb[16].mxu1 %v884_v23 }
 0x2a8   :  { %999 = vmatpush1.bf16.msra.mxu0 %v2549_v26  ;;  %1936 = vmatpush3.bf16.msra.mxu1 %v2568_v35 }
 0x2a9   :  { %1000 = vmatprep.subr.bf16.mxu0 %v2552_v27  ;;  %1937 = vmatprep.subr.bf16.mxu1 %v3039_v7 }
 0x2aa   :  { %1030 = vmatprep.mubr.bf16.mxu0 %v3040_v17  ;;  %1951 = vmatprep.mubr.msk.bf16.mxu1 %vm2432_vm0, %v3039_v7 }
 0x2ac   :  { %1001 = vmatpush1.bf16.msra.mxu0 %v2555_v29  ;;  %1938 = vmatpush3.bf16.msra.mxu1 %v2581_v40 }
 0x2ad   :  { %1002 = vmatprep.subr.bf16.mxu0 %v2559_v30  ;;  %1939 = vmatprep.subr.bf16.mxu1 %v3039_v7 }
 0x2b0   :  { %1003 = vmatpush1.bf16.msra.mxu0 %v2562_v32  ;;  %1940 = vmatpush3.bf16.msra.mxu1 %v2591_v43 }
 0x2b1   :  { %1004 = vmatprep.subr.bf16.mxu0 %v2565_v33  ;;  %1941 = vmatprep.subr.bf16.mxu1 %v3039_v7 }
 0x2b4   :  { %1005 = vmatpush1.bf16.msra.mxu0 %v2574_v37  ;;  %1942 = vmatpush3.bf16.msra.mxu1 %v2602_v47 }
 0x2b5   :  { %1006 = vmatprep.subr.bf16.mxu0 %v2578_v39  ;;  %1943 = vmatprep.subr.bf16.mxu1 %v3039_v7 }
 0x2b8   :  { %1007 = vmatpush1.bf16.msra.mxu0 %v2585_v41  ;;  %1944 = vmatpush3.bf16.msra.mxu1 %v2614_v50 }
 0x2b9   :  { %1008 = vmatprep.subr.bf16.mxu0 %v2588_v42  ;;  %1945 = vmatprep.subr.bf16.mxu1 %v3039_v7 }
 0x2bc   :  { %1009 = vmatpush1.bf16.msra.mxu0 %v2595_v45  ;;  %1946 = vmatpush3.bf16.msra.mxu1 %v2623_v52 }
 0x2bd   :  { %1010 = vmatprep.subr.bf16.mxu0 %v2599_v46  ;;  %1947 = vmatprep.subr.bf16.mxu1 %v3039_v7 }
 0x2c0   :  { %1011 = vmatpush1.bf16.msra.mxu0 %v2608_v48  ;;  %1948 = vmatpush3.bf16.msra.mxu1 %v2629_v53 }
 0x2c1   :  { %1012 = vmatprep.subr.bf16.mxu0 %v2611_v49  ;;  %1949 = vmatprep.subr.bf16.mxu1 %v3039_v7 }
 0x2c4   :  { %1013 = vmatpush1.bf16.msra.mxu0 %v2618_v51  ;;  %1950 = vmatpush3.bf16.msra.mxu1 %v2637_v55 }
 0x2c5   :  { %1111 = vmatprep.subr.bf16.mxu0 %v2547_v24  ;;  %1955 = vmatprep.subr.bf16.mxu1 %v3039_v7 }
 0x37a   :  { %v919_v22 = vpop.f32.mrb[24].mxu0  ;;  %v960_v2 = vpop.f32.mrb[16].mxu1 }
 0x37b   :  { %v966_v62 = vadd.f32 %v919_v22, %v2684_v9  ;;  %v921_v63 = vpop.f32.mrb[25].mxu0  ;;  %v1933_v34 = vpop.f32.mrb[17].mxu1  ;;  %v961_v4 = vadd.f32 %v2732_v61, %v960_v2 }
 0x37c   :  { %v967_v0 = vadd.f32 %v921_v63, %v2686_v11  ;;  %v923_v54 = vpop.f32.mrb[26].mxu0  ;;  %v963_v1 = vpop.f32.mrb[18].mxu1 }
 0x37d   :  { %v1737_v57 = vmul.f32 -1.442695, %v966_v62  ;;  %v924_v36 = vpop.f32.mrb[27].mxu0  ;;  %v1934_v21 = vpop.f32.mrb[19].mxu1 }
 0x37e   :  { %v1738_v15 = vmul.f32 -1.442695, %v967_v0 }
 0x37f   :  { %2199 = vpow2.f32 %v1737_v57 }
 0x380   :  { %2201 = vpow2.f32 %v1738_v15 }
 0x389   :  { %v2200_v3 = vpop.eup %2199 }
 0x38a   :  { %v974_v38 = vadd.f32 1.0, %v2200_v3  ;;  %v2202_v6 = vpop.eup %2201 }
 0x38b   :  { %v975_v58 = vadd.f32 1.0, %v2202_v6 }
 0x38c   :  { %2203 = vrcp.f32 %v974_v38 }
 0x38d   :  { %2205 = vrcp.f32 %v975_v58 }
 0x396   :  { %v2204_v9 = vpop.eup %2203 }
 0x397   :  { %v980_v5 = vmul.f32 %v2204_v9, %v961_v4  ;;  %v2206_v10 = vpop.eup %2205 }
 0x398   :  { %v983_v13 = vsub.f32 1.0, %v2206_v10  ;;  %v985_v62 = vmul.f32 %v2206_v10, %v2780_v19 }
 0x399   :  { %v981_v11 = vadd.f32 %v980_v5, %v2691_v16 }
 0x39b   :  { %2207 = vtanh.f32 %v981_v11 }
 0x3a5   :  { %v2208_v23 = vpop.eup %2207 }
 0x3a6   :  { %v984_v22 = vmul.f32 %v2208_v23, %v983_v13 }
 0x3a8   :  { %v2824_v63 = vadd.f32 %v985_v62, %v984_v22 }
 0x3aa   :  { %v997_v34 = vpack.c.bf16 %v2824_v63, %v2824_v63 }
 0x3ac   :  { %1031 = vmatmul.mubr.bf16.vlgmr.msra.gmra.mrb[28].mxu0 %v997_v34  ;;  %1952 = vmatmul.mubr.bf16.vlgmr.msra.gmra.mrb[20].mxu1 %v997_v34 }
 0x3ad   :  { %1112 = vmatpush1.bf16.msra.mxu0 %v2549_v26  ;;  %1956 = vmatpush3.bf16.msra.mxu1 %v2568_v35 }
 0x3ae   :  { %1113 = vmatprep.subr.bf16.mxu0 %v2552_v27  ;;  %1957 = vmatprep.subr.bf16.mxu1 %v3039_v7 }
 0x3af   :  { %1143 = vmatprep.mubr.bf16.mxu0 %v3040_v17  ;;  %1971 = vmatprep.mubr.msk.bf16.mxu1 %vm2432_vm0, %v3039_v7 }
 0x3b1   :  { %1114 = vmatpush1.bf16.msra.mxu0 %v2555_v29  ;;  %1958 = vmatpush3.bf16.msra.mxu1 %v2581_v40 }
 0x3b2   :  { %1115 = vmatprep.subr.bf16.mxu0 %v2559_v30  ;;  %1959 = vmatprep.subr.bf16.mxu1 %v3039_v7 }
 0x3b5   :  { %1116 = vmatpush1.bf16.msra.mxu0 %v2562_v32  ;;  %1960 = vmatpush3.bf16.msra.mxu1 %v2591_v43 }
 0x3b6   :  { %1117 = vmatprep.subr.bf16.mxu0 %v2565_v33  ;;  %1961 = vmatprep.subr.bf16.mxu1 %v3039_v7 }
 0x3b9   :  { %1118 = vmatpush1.bf16.msra.mxu0 %v2574_v37  ;;  %1962 = vmatpush3.bf16.msra.mxu1 %v2602_v47 }
 0x3ba   :  { %1119 = vmatprep.subr.bf16.mxu0 %v2578_v39  ;;  %1963 = vmatprep.subr.bf16.mxu1 %v3039_v7 }
 0x3bd   :  { %1120 = vmatpush1.bf16.msra.mxu0 %v2585_v41  ;;  %1964 = vmatpush3.bf16.msra.mxu1 %v2614_v50 }
 0x3be   :  { %1121 = vmatprep.subr.bf16.mxu0 %v2588_v42  ;;  %1965 = vmatprep.subr.bf16.mxu1 %v3039_v7 }
 0x3c1   :  { %1122 = vmatpush1.bf16.msra.mxu0 %v2595_v45  ;;  %1966 = vmatpush3.bf16.msra.mxu1 %v2623_v52 }
 0x3c2   :  { %1123 = vmatprep.subr.bf16.mxu0 %v2599_v46  ;;  %1967 = vmatprep.subr.bf16.mxu1 %v3039_v7 }
 0x3c5   :  { %1124 = vmatpush1.bf16.msra.mxu0 %v2608_v48  ;;  %1968 = vmatpush3.bf16.msra.mxu1 %v2629_v53 }
 0x3c6   :  { %1125 = vmatprep.subr.bf16.mxu0 %v2611_v49  ;;  %1969 = vmatprep.subr.bf16.mxu1 %v3039_v7 }
 0x3c9   :  { %1126 = vmatpush1.bf16.msra.mxu0 %v2618_v51  ;;  %1970 = vmatpush3.bf16.msra.mxu1 %v2637_v55 }
 0x3ca   :  { %1224 = vmatprep.subr.bf16.mxu0 %v2547_v24  ;;  %1975 = vmatprep.subr.bf16.mxu1 %v3039_v7 }
 0x47f   :  { %v1032_v16 = vpop.f32.mrb[28].mxu0  ;;  %v1073_v2 = vpop.f32.mrb[20].mxu1 }
 0x480   :  { %v1079_v0 = vadd.f32 %v1032_v16, %v2688_v14  ;;  %v1034_v54 = vpop.f32.mrb[29].mxu0  ;;  %v1953_v1 = vpop.f32.mrb[21].mxu1  ;;  %v1074_v11 = vadd.f32 %v2732_v61, %v1073_v2 }
 0x481   :  { %v1080_v57 = vadd.f32 %v1034_v54, %v2693_v18  ;;  %v1036_v36 = vpop.f32.mrb[30].mxu0  ;;  %v1076_v21 = vpop.f32.mrb[22].mxu1 }
 0x482   :  { %v1739_v15 = vmul.f32 -1.442695, %v1079_v0  ;;  %v1037_v3 = vpop.f32.mrb[31].mxu0  ;;  %v1954_v38 = vpop.f32.mrb[23].mxu1 }
 0x483   :  { %v1740_v6 = vmul.f32 -1.442695, %v1080_v57 }
 0x484   :  { %2209 = vpow2.f32 %v1739_v15 }
 0x485   :  { %2211 = vpow2.f32 %v1740_v6 }
 0x48e   :  { %v2210_v58 = vpop.eup %2209 }
 0x48f   :  { %v1087_v4 = vadd.f32 1.0, %v2210_v58  ;;  %v2212_v9 = vpop.eup %2211 }
 0x490   :  { %v1088_v5 = vadd.f32 1.0, %v2212_v9 }
 0x491   :  { %2213 = vrcp.f32 %v1087_v4 }
 0x492   :  { %2215 = vrcp.f32 %v1088_v5 }
 0x49b   :  { %v2214_v14 = vpop.eup %2213 }
 0x49c   :  { %v1093_v10 = vmul.f32 %v2214_v14, %v1074_v11  ;;  %v2216_v13 = vpop.eup %2215 }
 0x49d   :  { %v1096_v23 = vsub.f32 1.0, %v2216_v13  ;;  %v1098_v34 = vmul.f32 %v2216_v13, %v2824_v63 }
 0x49e   :  { %v1094_v18 = vadd.f32 %v1093_v10, %v2696_v20 }
 0x4a0   :  { %2217 = vtanh.f32 %v1094_v18 }
 0x4aa   :  { %v2218_v22 = vpop.eup %2217 }
 0x4ab   :  { %v1097_v62 = vmul.f32 %v2218_v22, %v1096_v23 }
 0x4ad   :  { %v2868_v16 = vadd.f32 %v1098_v34, %v1097_v62 }
 0x4af   :  { %v1110_v0 = vpack.c.bf16 %v2868_v16, %v2868_v16 }
 0x4b1   :  { %1144 = vmatmul.mubr.bf16.vlgmr.msra.gmra.mrb[32].mxu0 %v1110_v0  ;;  %1972 = vmatmul.mubr.bf16.vlgmr.msra.gmra.mrb[24].mxu1 %v1110_v0 }
 0x4b2   :  { %1225 = vmatpush1.bf16.msra.mxu0 %v2549_v26  ;;  %1976 = vmatpush3.bf16.msra.mxu1 %v2568_v35 }
 0x4b3   :  { %1226 = vmatprep.subr.bf16.mxu0 %v2552_v27  ;;  %1977 = vmatprep.subr.bf16.mxu1 %v3039_v7 }
 0x4b4   :  { %1256 = vmatprep.mubr.bf16.mxu0 %v3040_v17  ;;  %1991 = vmatprep.mubr.msk.bf16.mxu1 %vm2432_vm0, %v3039_v7 }
 0x4b6   :  { %1227 = vmatpush1.bf16.msra.mxu0 %v2555_v29  ;;  %1978 = vmatpush3.bf16.msra.mxu1 %v2581_v40 }
 0x4b7   :  { %1228 = vmatprep.subr.bf16.mxu0 %v2559_v30  ;;  %1979 = vmatprep.subr.bf16.mxu1 %v3039_v7 }
 0x4ba   :  { %1229 = vmatpush1.bf16.msra.mxu0 %v2562_v32  ;;  %1980 = vmatpush3.bf16.msra.mxu1 %v2591_v43 }
 0x4bb   :  { %1230 = vmatprep.subr.bf16.mxu0 %v2565_v33  ;;  %1981 = vmatprep.subr.bf16.mxu1 %v3039_v7 }
 0x4be   :  { %1231 = vmatpush1.bf16.msra.mxu0 %v2574_v37  ;;  %1982 = vmatpush3.bf16.msra.mxu1 %v2602_v47 }
 0x4bf   :  { %1232 = vmatprep.subr.bf16.mxu0 %v2578_v39  ;;  %1983 = vmatprep.subr.bf16.mxu1 %v3039_v7 }
 0x4c2   :  { %1233 = vmatpush1.bf16.msra.mxu0 %v2585_v41  ;;  %1984 = vmatpush3.bf16.msra.mxu1 %v2614_v50 }
 0x4c3   :  { %1234 = vmatprep.subr.bf16.mxu0 %v2588_v42  ;;  %1985 = vmatprep.subr.bf16.mxu1 %v3039_v7 }
 0x4c6   :  { %1235 = vmatpush1.bf16.msra.mxu0 %v2595_v45  ;;  %1986 = vmatpush3.bf16.msra.mxu1 %v2623_v52 }
 0x4c7   :  { %1236 = vmatprep.subr.bf16.mxu0 %v2599_v46  ;;  %1987 = vmatprep.subr.bf16.mxu1 %v3039_v7 }
 0x4ca   :  { %1237 = vmatpush1.bf16.msra.mxu0 %v2608_v48  ;;  %1988 = vmatpush3.bf16.msra.mxu1 %v2629_v53 }
 0x4cb   :  { %1238 = vmatprep.subr.bf16.mxu0 %v2611_v49  ;;  %1989 = vmatprep.subr.bf16.mxu1 %v3039_v7 }
 0x4ce   :  { %1239 = vmatpush1.bf16.msra.mxu0 %v2618_v51  ;;  %1990 = vmatpush3.bf16.msra.mxu1 %v2637_v55 }
 0x4cf   :  { %1337 = vmatprep.subr.bf16.mxu0 %v2547_v24  ;;  %1995 = vmatprep.subr.bf16.mxu1 %v3039_v7 }
 0x584   :  { %v1145_v20 = vpop.f32.mrb[32].mxu0  ;;  %v1186_v2 = vpop.f32.mrb[24].mxu1 }
 0x585   :  { %v1192_v54 = vadd.f32 %v1145_v20, %v2701_v25  ;;  %v1147_v1 = vpop.f32.mrb[33].mxu0  ;;  %v1973_v57 = vpop.f32.mrb[25].mxu1  ;;  %v1187_v11 = vadd.f32 %v2732_v61, %v1186_v2 }
 0x586   :  { %v1193_v36 = vadd.f32 %v1147_v1, %v2703_v31  ;;  %v1149_v21 = vpop.f32.mrb[34].mxu0  ;;  %v1189_v15 = vpop.f32.mrb[26].mxu1 }
 0x587   :  { %v1741_v3 = vmul.f32 -1.442695, %v1192_v54  ;;  %v1150_v38 = vpop.f32.mrb[35].mxu0  ;;  %v1974_v6 = vpop.f32.mrb[27].mxu1  ;;  %v2261_v21 = vld [vmem:[#allocation11] sm:$0xff]  }
 0x588   :  { %v1742_v58 = vmul.f32 -1.442695, %v1193_v36  ;;  %v2260_v36 = vld [vmem:[#allocation10] ss:$8 sps:$4 sm:$0xff]   ;;  %v2262_v15 = vld [vmem:[#allocation10 + $0x14] ss:$8 sps:$4 sm:$0xff]  }
 0x589   :  { %2219 = vpow2.f32 %v1741_v3  ;;  %v2264_v3 = vld [vmem:[#allocation11 + $0x8] sm:$0xff]  }
 0x58a   :  { %2221 = vpow2.f32 %v1742_v58  ;;  %v2265_v38 = vld [vmem:[#allocation10 + $0x24] ss:$8 sps:$4 sm:$0xff]   ;;  %v2266_v6 = vld [vmem:[#allocation10 + $0x20] ss:$8 sps:$4 sm:$0xff]   ;;  %v2267_v58 = vld [vmem:[#allocation11 + $0x10] sm:$0xff]  }
 0x593   :  { %v2220_v4 = vpop.eup %2219 }
 0x594   :  { %v1200_v24 = vadd.f32 1.0, %v2220_v4  ;;  %v2222_v9 = vpop.eup %2221  ;;  %v2268_v4 = vld [vmem:[#allocation10 + $0x34] ss:$8 sps:$4 sm:$0xff]  }
 0x595   :  { %v1201_v5 = vadd.f32 1.0, %v2222_v9  ;;  %v2271_v9 = vld [vmem:[#allocation10 + $0x44] ss:$8 sps:$4 sm:$0xff]  }
 0x596   :  { %2223 = vrcp.f32 %v1200_v24  ;;  %v2270_v24 = vld [vmem:[#allocation11 + $0x18] sm:$0xff]  }
 0x597   :  { %2225 = vrcp.f32 %v1201_v5  ;;  %v2272_v5 = vld [vmem:[#allocation10 + $0x40] ss:$8 sps:$4 sm:$0xff]  }
 0x5a0   :  { %v2224_v25 = vpop.eup %2223 }
 0x5a1   :  { %v1206_v14 = vmul.f32 %v2224_v25, %v1187_v11  ;;  %v2226_v10 = vpop.eup %2225  ;;  %v2273_v11 = vld [vmem:[#allocation10 + $0x54] ss:$8 sps:$4 sm:$0xff]   ;;  %v2274_v25 = vld [vmem:[#allocation10 + $0x50] ss:$8 sps:$4 sm:$0xff]  }
 0x5a2   :  { %v1209_v18 = vsub.f32 1.0, %v2226_v10  ;;  %v1211_v22 = vmul.f32 %v2226_v10, %v2868_v16  ;;  %v2277_v10 = vld [vmem:[#allocation10 + $0x74] ss:$8 sps:$4 sm:$0xff]  }
 0x5a3   :  { %v1207_v31 = vadd.f32 %v1206_v14, %v2713_v60  ;;  %v2275_v14 = vld [vmem:[#allocation10 + $0x64] ss:$8 sps:$4 sm:$0xff]  }
 0x5a5   :  { %2227 = vtanh.f32 %v1207_v31  ;;  %v2276_v31 = vld [vmem:[#allocation10 + $0x60] ss:$8 sps:$4 sm:$0xff]  }
 0x5af   :  { %v2228_v13 = vpop.eup %2227 }
 0x5b0   :  { %v1210_v23 = vmul.f32 %v2228_v13, %v1209_v18  ;;  %v3041_v18 = vmov 0.0|0.0  }
 0x5b2   :  { %v2912_v62 = vadd.f32 %v1211_v22, %v1210_v23 }
 0x5b4   :  { %v1223_v34 = vpack.c.bf16 %v2912_v62, %v2912_v62 }
 0x5b6   :  { %1257 = vmatmul.mubr.bf16.vlgmr.msra.gmra.mrb[36].mxu0 %v1223_v34  ;;  %1992 = vmatmul.mubr.bf16.vlgmr.msra.gmra.mrb[28].mxu1 %v1223_v34 }
 0x5b7   :  { %1338 = vmatpush1.bf16.msra.mxu0 %v2549_v26  ;;  %1996 = vmatpush3.bf16.msra.mxu1 %v2568_v35  ;;  %v2259_v26 = vld [vmem:[#allocation10 + $0x4] ss:$8 sps:$4 sm:$0xff]  }
 0x5b8   :  { %1339 = vmatprep.subr.bf16.mxu0 %v2552_v27  ;;  %1997 = vmatprep.subr.bf16.mxu1 %v3039_v7 }
 0x5b9   :  { %1369 = vmatprep.mubr.bf16.mxu0 %v3040_v17  ;;  %2011 = vmatprep.mubr.msk.bf16.mxu1 %vm2432_vm0, %v3039_v7 }
 0x5bb   :  { %1340 = vmatpush1.bf16.msra.mxu0 %v2555_v29  ;;  %1998 = vmatpush3.bf16.msra.mxu1 %v2581_v40 }
 0x5bc   :  { %1341 = vmatprep.subr.bf16.mxu0 %v2559_v30  ;;  %1999 = vmatprep.subr.bf16.mxu1 %v3039_v7 }
 0x5bf   :  { %1342 = vmatpush1.bf16.msra.mxu0 %v2562_v32  ;;  %2000 = vmatpush3.bf16.msra.mxu1 %v2591_v43 }
 0x5c0   :  { %1343 = vmatprep.subr.bf16.mxu0 %v2565_v33  ;;  %2001 = vmatprep.subr.bf16.mxu1 %v3039_v7 }
 0x5c3   :  { %1344 = vmatpush1.bf16.msra.mxu0 %v2574_v37  ;;  %2002 = vmatpush3.bf16.msra.mxu1 %v2602_v47 }
 0x5c4   :  { %1345 = vmatprep.subr.bf16.mxu0 %v2578_v39  ;;  %2003 = vmatprep.subr.bf16.mxu1 %v3039_v7 }
 0x5c7   :  { %1346 = vmatpush1.bf16.msra.mxu0 %v2585_v41  ;;  %2004 = vmatpush3.bf16.msra.mxu1 %v2614_v50 }
 0x5c8   :  { %1347 = vmatprep.subr.bf16.mxu0 %v2588_v42  ;;  %2005 = vmatprep.subr.bf16.mxu1 %v3039_v7 }
 0x5cb   :  { %1348 = vmatpush1.bf16.msra.mxu0 %v2595_v45  ;;  %2006 = vmatpush3.bf16.msra.mxu1 %v2623_v52 }
 0x5cc   :  { %1349 = vmatprep.subr.bf16.mxu0 %v2599_v46  ;;  %2007 = vmatprep.subr.bf16.mxu1 %v3039_v7 }
 0x5cf   :  { %1350 = vmatpush1.bf16.msra.mxu0 %v2608_v48  ;;  %2008 = vmatpush3.bf16.msra.mxu1 %v2629_v53 }
 0x5d0   :  { %1351 = vmatprep.subr.bf16.mxu0 %v2611_v49  ;;  %2009 = vmatprep.subr.bf16.mxu1 %v3039_v7 }
 0x5d3   :  { %1352 = vmatpush1.bf16.msra.mxu0 %v2618_v51  ;;  %2010 = vmatpush3.bf16.msra.mxu1 %v2637_v55 }
 0x5d4   :  { %1450 = vmatprep.subr.bf16.mxu0 %v2259_v26  ;;  %2015 = vmatprep.subr.bf16.mxu1 %v3039_v7  ;;  %v3042_v26 = vld [vmem:[#allocation21_spill] sm:$0xff] }
 0x689   :  { %v1258_v27 = vpop.f32.mrb[36].mxu0  ;;  %v1299_v29 = vpop.f32.mrb[28].mxu1 }
 0x68a   :  { %v1305_v30 = vadd.f32 %v1258_v27, %v2705_v44  ;;  %v1260_v32 = vpop.f32.mrb[37].mxu0  ;;  %v1993_v33 = vpop.f32.mrb[29].mxu1  ;;  %v1300_v49 = vadd.f32 %v2732_v61, %v1299_v29 }
 0x68b   :  { %v1306_v35 = vadd.f32 %v1260_v32, %v2710_v59  ;;  %v1262_v37 = vpop.f32.mrb[38].mxu0  ;;  %v1302_v39 = vpop.f32.mrb[30].mxu1 }
 0x68c   :  { %v1743_v40 = vmul.f32 -1.442695, %v1305_v30  ;;  %v1263_v41 = vpop.f32.mrb[39].mxu0  ;;  %v1994_v42 = vpop.f32.mrb[31].mxu1 }
 0x68d   :  { %v1744_v43 = vmul.f32 -1.442695, %v1306_v35 }
 0x68e   :  { %2229 = vpow2.f32 %v1743_v40 }
 0x68f   :  { %2231 = vpow2.f32 %v1744_v43  ;;  %v3043_v43 = vld [vmem:[#allocation19_spill] sm:$0xff] }
 0x698   :  { %v2230_v45 = vpop.eup %2229 }
 0x699   :  { %v1313_v46 = vadd.f32 1.0, %v2230_v45  ;;  %v2232_v47 = vpop.eup %2231 }
 0x69a   :  { %v1314_v48 = vadd.f32 1.0, %v2232_v47 }
 0x69b   :  { %2233 = vrcp.f32 %v1313_v46 }
 0x69c   :  { %2235 = vrcp.f32 %v1314_v48 }
 0x6a5   :  { %v2234_v51 = vpop.eup %2233 }
 0x6a6   :  { %v1319_v44 = vmul.f32 %v2234_v51, %v1300_v49  ;;  %v2236_v60 = vpop.eup %2235 }
 0x6a7   :  { %v1322_v0 = vsub.f32 1.0, %v2236_v60  ;;  %v1324_v54 = vmul.f32 %v2236_v60, %v2912_v62  ;;  %v1562_v60 = vld [vmem:[#allocation13] sm:$0xff] }
 0x6a8   :  { %v1320_v59 = vadd.f32 %v1319_v44, %v2719_v8  ;;  %v2263_v8 = vld [vmem:[#allocation10 + $0x10] ss:$8 sps:$4 sm:$0xff]  }
 0x6aa   :  { %2237 = vtanh.f32 %v1320_v59 }
 0x6b4   :  { %v2238_v20 = vpop.eup %2237 }
 0x6b5   :  { %v1323_v2 = vmul.f32 %v2238_v20, %v1322_v0  ;;  %v1563_v0 = vld [vmem:[#allocation13 + $0x8] sm:$0xff] }
 0x6b6   :  { %v2071_v20 = vpack.c.bf16 %v1563_v0, %v1562_v60 }
 0x6b7   :  { %v2955_v1 = vadd.f32 %v1324_v54, %v1323_v2  ;;  %v1564_v2 = vld [vmem:[#allocation13 + $0x10] sm:$0xff]  ;;  %v1565_v54 = vld [vmem:[#allocation13 + $0x18] sm:$0xff] }
 0x6b9   :  { %v1336_v57 = vpack.c.bf16 %v2955_v1, %v2955_v1 }
 0x6bb   :  { %1370 = vmatmul.mubr.bf16.vlgmr.msra.gmra.mrb[40].mxu0 %v1336_v57  ;;  %2012 = vmatmul.mubr.bf16.vlgmr.msra.gmra.mrb[32].mxu1 %v1336_v57  ;;  %v2074_v57 = vpack.c.bf16 %v1565_v54, %v1564_v2 }
 0x6bc   :  { %1451 = vmatpush1.bf16.msra.mxu0 %v2260_v36  ;;  %2016 = vmatpush3.bf16.msra.mxu1 %v2261_v21  ;;  %v1566_v36 = vld [vmem:[#allocation13 + $0x20] sm:$0xff]  ;;  %v1567_v21 = vld [vmem:[#allocation13 + $0x28] sm:$0xff] }
 0x6bd   :  { %1452 = vmatprep.subr.bf16.mxu0 %v2262_v15  ;;  %2017 = vmatprep.subr.bf16.mxu1 %v3039_v7  ;;  %v2077_v15 = vpack.c.bf16 %v1567_v21, %v1566_v36 }
 0x6be   :  { %1482 = vmatprep.mubr.bf16.mxu0 %v3040_v17  ;;  %2031 = vmatprep.mubr.msk.bf16.mxu1 %vm2432_vm0, %v3039_v7  ;;  %v2269_v17 = vld [vmem:[#allocation10 + $0x30] ss:$8 sps:$4 sm:$0xff]  }
 0x6c0   :  { %1453 = vmatpush1.bf16.msra.mxu0 %v2263_v8  ;;  %2018 = vmatpush3.bf16.msra.mxu1 %v2264_v3  ;;  %v1568_v8 = vld [vmem:[#allocation13 + $0x30] sm:$0xff] }
 0x6c1   :  { %1454 = vmatprep.subr.bf16.mxu0 %v2265_v38  ;;  %2019 = vmatprep.subr.bf16.mxu1 %v3039_v7  ;;  %v1570_v38 = vld [vmem:[#allocation13 + $0x40] sm:$0xff] }
 0x6c4   :  { %1455 = vmatpush1.bf16.msra.mxu0 %v2266_v6  ;;  %2020 = vmatpush3.bf16.msra.mxu1 %v2267_v58  ;;  %v1571_v6 = vld [vmem:[#allocation13 + $0x48] sm:$0xff] }
 0x6c5   :  { %1456 = vmatprep.subr.bf16.mxu0 %v2268_v4  ;;  %2021 = vmatprep.subr.bf16.mxu1 %v3039_v7  ;;  %v2083_v58 = vpack.c.bf16 %v1571_v6, %v1570_v38  ;;  %v1572_v4 = vld [vmem:[#allocation13 + $0x50] sm:$0xff] }
 0x6c8   :  { %1457 = vmatpush1.bf16.msra.mxu0 %v2269_v17  ;;  %2022 = vmatpush3.bf16.msra.mxu1 %v2270_v24  ;;  %v1573_v17 = vld [vmem:[#allocation13 + $0x58] sm:$0xff] }
 0x6c9   :  { %1458 = vmatprep.subr.bf16.mxu0 %v2271_v9  ;;  %2023 = vmatprep.subr.bf16.mxu1 %v3039_v7  ;;  %v2086_v24 = vpack.c.bf16 %v1573_v17, %v1572_v4  ;;  %v1574_v9 = vld [vmem:[#allocation13 + $0x60] sm:$0xff] }
 0x6cc   :  { %1459 = vmatpush1.bf16.msra.mxu0 %v2272_v5  ;;  %2024 = vmatpush3.bf16.msra.mxu1 %v2614_v50  ;;  %v2278_v50 = vld [vmem:[#allocation10 + $0x70] ss:$8 sps:$4 sm:$0xff]   ;;  %v1575_v5 = vld [vmem:[#allocation13 + $0x68] sm:$0xff] }
 0x6cd   :  { %1460 = vmatprep.subr.bf16.mxu0 %v2273_v11  ;;  %2025 = vmatprep.subr.bf16.mxu1 %v3039_v7  ;;  %v2089_v11 = vpack.c.bf16 %v1575_v5, %v1574_v9 }
 0x6d0   :  { %1461 = vmatpush1.bf16.msra.mxu0 %v2274_v25  ;;  %2026 = vmatpush3.bf16.msra.mxu1 %v2623_v52  ;;  %v1576_v25 = vld [vmem:[#allocation13 + $0x70] sm:$0xff] }
 0x6d1   :  { %1462 = vmatprep.subr.bf16.mxu0 %v2275_v14  ;;  %2027 = vmatprep.subr.bf16.mxu1 %v3039_v7  ;;  %v1577_v14 = vld [vmem:[#allocation13 + $0x78] sm:$0xff] }
 0x6d4   :  { %1463 = vmatpush1.bf16.msra.mxu0 %v2276_v31  ;;  %2028 = vmatpush3.bf16.msra.mxu1 %v2629_v53  ;;  %v2092_v31 = vpack.c.bf16 %v1577_v14, %v1576_v25 }
 0x6d5   :  { %1464 = vmatprep.subr.bf16.mxu0 %v2277_v10  ;;  %2029 = vmatprep.subr.bf16.mxu1 %v3039_v7 }
 0x6d8   :  { %1465 = vmatpush1.bf16.msra.mxu0 %v2278_v50  ;;  %2030 = vmatpush3.bf16.msra.mxu1 %v2637_v55 }
 0x6d9   :  { %2070 = vmatprep.subr.bf16.mxu0 %v3041_v18 }
 0x78e   :  { %v1371_v13 = vpop.f32.mrb[40].mxu0  ;;  %v1412_v52 = vpop.f32.mrb[32].mxu1 }
 0x78f   :  { %v1418_v23 = vadd.f32 %v1371_v13, %v2721_v12  ;;  %v1373_v22 = vpop.f32.mrb[41].mxu0  ;;  %v2013_v34 = vpop.f32.mrb[33].mxu1  ;;  %v1413_v41 = vadd.f32 %v2732_v61, %v1412_v52  ;;  %v3044_v13 = vld [vmem:[#allocation22_spill] sm:$0xff] }
 0x790   :  { %v1419_v27 = vadd.f32 %v1373_v22, %v3042_v26  ;;  %v1375_v29 = vpop.f32.mrb[42].mxu0  ;;  %v1415_v53 = vpop.f32.mrb[34].mxu1 }
 0x791   :  { %v1745_v30 = vmul.f32 -1.442695, %v1418_v23  ;;  %v1376_v32 = vpop.f32.mrb[43].mxu0  ;;  %v2014_v33 = vpop.f32.mrb[35].mxu1 }
 0x792   :  { %v1746_v35 = vmul.f32 -1.442695, %v1419_v27 }
 0x793   :  { %2239 = vpow2.f32 %v1745_v30 }
 0x794   :  { %2241 = vpow2.f32 %v1746_v35 }
 0x79d   :  { %v2240_v37 = vpop.eup %2239 }
 0x79e   :  { %v1426_v55 = vadd.f32 1.0, %v2240_v37  ;;  %v2242_v39 = vpop.eup %2241 }
 0x79f   :  { %v1427_v40 = vadd.f32 1.0, %v2242_v39 }
 0x7a0   :  { %2243 = vrcp.f32 %v1426_v55 }
 0x7a1   :  { %2245 = vrcp.f32 %v1427_v40 }
 0x7aa   :  { %v2244_v12 = vpop.eup %2243 }
 0x7ab   :  { %v1432_v42 = vmul.f32 %v2244_v12, %v1413_v41  ;;  %v2246_v46 = vpop.eup %2245  ;;  %v3045_v41 = vld [vmem:[#allocation20_spill] sm:$0xff]  ;;  %v482_v12 = vpop.permute.xlu0 %481 }
 0x7ac   :  { %v1435_v47 = vsub.f32 1.0, %v2246_v46  ;;  %v1437_v51 = vmul.f32 %v2246_v46, %v2955_v1  ;;  %vm763_vm1 = vcmp.eq.s32.totalorder %v482_v12, 0  ;;  %vm876_vm2 = vcmp.eq.s32.totalorder %v482_v12, 1 }
 0x7ad   :  { %v1433_v45 = vadd.f32 %v1432_v42, %v3043_v43  ;;  %vm989_vm3 = vcmp.eq.s32.totalorder %v482_v12, 2  ;;  %v764_v43 = vsel %vm763_vm1, %v2736_v56, 0.0  ;;  %vm1102_vm4 = vcmp.eq.s32.totalorder %v482_v12, 3 }
 0x7ae   :  { %vm1215_vm5 = vcmp.eq.s32.totalorder %v482_v12, 4  ;;  %vm1328_vm6 = vcmp.eq.s32.totalorder %v482_v12, 5  ;;  %vm1441_vm7 = vcmp.eq.s32.totalorder %v482_v12, 6  ;;  %vm1554_vm8 = vcmp.eq.s32.totalorder %v482_v12, 7 }
 0x7af   :  { %2247 = vtanh.f32 %v1433_v45  ;;  %v877_v45 = vsel %vm876_vm2, %v2780_v19, %v764_v43 }
 0x7b9   :  { %v2248_v48 = vpop.eup %2247 }
 0x7ba   :  { %v1436_v49 = vmul.f32 %v2248_v48, %v1435_v47 }
 0x7bc   :  { %v2979_v44 = vadd.f32 %v1437_v51, %v1436_v49 }
 0x7be   :  { %v1449_v59 = vpack.c.bf16 %v2979_v44, %v2979_v44 }
 0x7c0   :  { %1483 = vmatmul.mubr.bf16.vlgmr.msra.gmra.mrb[44].mxu0 %v1449_v59  ;;  %2032 = vmatmul.mubr.bf16.vlgmr.msra.gmra.mrb[36].mxu1 %v1449_v59 }
 0x7c1   :  { %2067 = vmatprep.mubr.msk.f32.mxu0 %vm2432_vm0, %v3039_v7  ;;  %2072 = vmatpush3.bf16.msra.mxu0 %v2071_v20  ;;  %v1569_v7 = vld [vmem:[#allocation13 + $0x38] sm:$0xff] }
 0x7c2   :  { %2073 = vmatprep.subr.bf16.mxu0 %v3041_v18  ;;  %v2080_v3 = vpack.c.bf16 %v1569_v7, %v1568_v8 }
 0x7c5   :  { %2075 = vmatpush3.bf16.msra.mxu0 %v2074_v57 }
 0x7c6   :  { %2076 = vmatprep.subr.bf16.mxu0 %v3041_v18 }
 0x7c9   :  { %2078 = vmatpush3.bf16.msra.mxu0 %v2077_v15 }
 0x7ca   :  { %2079 = vmatprep.subr.bf16.mxu0 %v3041_v18 }
 0x7cd   :  { %2081 = vmatpush3.bf16.msra.mxu0 %v2080_v3 }
 0x7ce   :  { %2082 = vmatprep.subr.bf16.mxu0 %v3041_v18 }
 0x7d1   :  { %2084 = vmatpush3.bf16.msra.mxu0 %v2083_v58 }
 0x7d2   :  { %2085 = vmatprep.subr.bf16.mxu0 %v3041_v18 }
 0x7d5   :  { %2087 = vmatpush3.bf16.msra.mxu0 %v2086_v24 }
 0x7d6   :  { %2088 = vmatprep.subr.bf16.mxu0 %v3041_v18 }
 0x7d9   :  { %2090 = vmatpush3.bf16.msra.mxu0 %v2089_v11 }
 0x7da   :  { %2091 = vmatprep.subr.bf16.mxu0 %v3041_v18 }
 0x7dd   :  { %2093 = vmatpush3.bf16.msra.mxu0 %v2092_v31 }
 0x893   :  { %v1484_v10 = vpop.f32.mrb[44].mxu0  ;;  %v1525_v50 = vpop.f32.mrb[36].mxu1 }
 0x894   :  { %v1531_v52 = vadd.f32 %v1484_v10, %v3044_v13  ;;  %v1486_v23 = vpop.f32.mrb[45].mxu0  ;;  %v2033_v22 = vpop.f32.mrb[37].mxu1  ;;  %v1526_v55 = vadd.f32 %v2732_v61, %v1525_v50  ;;  %v990_v61 = vsel %vm989_vm3, %v2824_v63, %v877_v45  ;;  %v1749_v63 = vld [vmem:[%s3027_s8] ss:$0 sm:$0xff] }
 0x895   :  { %v1532_v34 = vadd.f32 %v1486_v23, %v2727_v28  ;;  %v1488_v26 = vpop.f32.mrb[46].mxu0  ;;  %v1528_v27 = vpop.f32.mrb[38].mxu1  ;;  %v1103_v48 = vsel %vm1102_vm4, %v2868_v16, %v990_v61 }
 0x896   :  { %v1747_v29 = vmul.f32 -1.442695, %v1531_v52  ;;  %v1489_v53 = vpop.f32.mrb[47].mxu0  ;;  %v2034_v30 = vpop.f32.mrb[39].mxu1  ;;  %v1216_v59 = vsel %vm1215_vm5, %v2912_v62, %v1103_v48 }
 0x897   :  { %v1748_v32 = vmul.f32 -1.442695, %v1532_v34  ;;  %v1329_v60 = vsel %vm1328_vm6, %v2955_v1, %v1216_v59 }
 0x898   :  { %2249 = vpow2.f32 %v1747_v29  ;;  %v1442_v0 = vsel %vm1441_vm7, %v2979_v44, %v1329_v60 }
 0x899   :  { %2251 = vpow2.f32 %v1748_v32 }
 0x8a2   :  { %v2250_v33 = vpop.eup %2249 }
 0x8a3   :  { %v1539_v35 = vadd.f32 1.0, %v2250_v33  ;;  %v2252_v18 = vpop.eup %2251 }
 0x8a4   :  { %v1540_v37 = vadd.f32 1.0, %v2252_v18 }
 0x8a5   :  { %2253 = vrcp.f32 %v1539_v35 }
 0x8a6   :  { %2255 = vrcp.f32 %v1540_v37 }
 0x8af   :  { %v2254_v39 = vpop.eup %2253 }
 0x8b0   :  { %v1545_v40 = vmul.f32 %v2254_v39, %v1526_v55  ;;  %v2256_v42 = vpop.eup %2255 }
 0x8b1   :  { %v1548_v46 = vsub.f32 1.0, %v2256_v42  ;;  %v1550_v51 = vmul.f32 %v2256_v42, %v2979_v44 }
 0x8b2   :  { %v1546_v28 = vadd.f32 %v1545_v40, %v3045_v41 }
 0x8b4   :  { %2257 = vtanh.f32 %v1546_v28 }
 0x8be   :  { %v2258_v47 = vpop.eup %2257 }
 0x8bf   :  { %v1549_v49 = vmul.f32 %v2258_v47, %v1548_v46 }
 0x8c1   :  { %v1551_v56 = vadd.f32 %v1550_v51, %v1549_v49 }
 0x8c3   :  { %v1555_v19 = vsel %vm1554_vm8, %v1551_v56, %v1442_v0 }
 0x8c4   :  { %2068 = vmatmul.mubr.f32.vlgmr.msra.gmra.mrb[48].mxu0 %v1555_v19 }
 0x997   :  { %v1651_v16 = vpop.f32.mrb[48].mxu0 }
 0x998   :  { %v1652_v20 = vadd.f32 %v1749_v63, %v1651_v16  ;;  %v2069_v2 = vpop.f32.mrb[49].mxu0 }
 0x99a   :  { %1655 = vst [vmem:[#allocation14] sm:$0xff] %v1652_v20 }
 0x99b   :  { %2400 = shalt.err (!%p2397_p2)
}
 0x99c   :  { %s2401_s0 = scalar_lea.hbm %s3028_s9, 128 }
 0x99d   :  { %p2402_p3 = scmp.ne.s32.totalorder %s3028_s9, %s2401_s0  ;;  %p2405_p4 = scmp.lt.u32.totalorder %s2401_s0, %s3028_s9 }
 0x99f   :  { %p2407_p5 = pnand %p2405_p4, %p2402_p3 }
 0x9a1   :  { %2410 = shalt.err (!%p2407_p5)
}
 0x9a2   :  { %1665 = dma.vmem_to_hbm [thread:$0]  %s1663_s13, 128, %s3028_s9, [#allocation7]  }
 0x9a3   :  { %2417 = dma.done.wait [#allocation7], 128  }
 0x9a4   :  { %2418 = vsyncadd [#allocation7], 4294967168 }
 0x9a5   :  { %1669 = vsyncpa [#allocation6], 1 }
 0x9a6   :  { %1670 = vsyncpa [#allocation9], 1 }
 0x9a7   :  { %1671 = vsyncpa [#allocation12], 1 }
 0x9a8   :  { %1672 = vsyncpa [#allocation7], 1 }

</bundles_post_ra>
